<compile_context>
chip_gen: v7x
topology: tpu7x:2x2x1
jax: 0.10.0
libtpu: 0.0.40
codegen_flags: <defaults>
</compile_context>

<pallas_src>
import jax
import jax.numpy as jnp
from jax.experimental import pallas as pl
from jax.experimental.pallas import tpu as pltpu


def _round_up(x, m):
    return ((x + m - 1) // m) * m


def _embed_kernel(ids_ref, table_ref, out_ref):
    # ids_ref:   (tile_n, 1) int32      -- category id per token
    # table_ref: (n_categories, dim)    -- flattened per-category rows, already
    #                                      in the compute dtype (no per-step cast)
    # out_ref:   (tile_n, dim)
    ids = ids_ref[...]
    table = table_ref[...]
    tile_n = ids.shape[0]
    n_cat = table.shape[0]
    cat_iota = jax.lax.broadcasted_iota(jnp.int32, (tile_n, n_cat), 1)
    onehot = (ids == cat_iota).astype(table.dtype)           # (tile_n, n_cat)
    # Pin HIGHEST precision on the f32 path so the one-hot gather is bit-exact
    # (default TPU precision would run the f32 dot as truncated bf16 passes).
    # A bf16 table is a single native MXU pass either way.
    precision = (jax.lax.Precision.HIGHEST
                 if table.dtype == jnp.float32 else jax.lax.Precision.DEFAULT)
    out_ref[...] = jnp.dot(
        onehot,
        table,
        precision=precision,
        preferred_element_type=jnp.float32,
    ).astype(out_ref.dtype)


def symbolic_embeddings_forward(inputs, symbols, pattern, augments=None, *,
                                tile_n=512, compute_dtype=None):
    """Forward pass, mode='concat'.

    out[..., :P*D]  = symbols[pattern[inputs]].reshape(*inputs.shape, P*D)
    out[..., P*D:]  = augments[inputs]            (if augments is not None)
    """
    n_categories, pattern_length = pattern.shape
    _, symbol_dim = symbols.shape
    if compute_dtype is None:
        compute_dtype = symbols.dtype
    compute_dtype = jnp.dtype(compute_dtype)

    # Parameter-setup glue (once, outside the kernel): flatten each category's
    # symbol pattern into one row, append augments, cast once to the compute
    # dtype so the kernel never re-casts the table per grid iteration.
    table = symbols[pattern].reshape(n_categories, pattern_length * symbol_dim)
    if augments is not None:
        table = jnp.concatenate([table, augments], axis=-1)
    table = table.astype(compute_dtype)
    dim = table.shape[-1]

    # Flatten tokens; clamp ids into range (matches gather clamp semantics).
    ids_flat = jnp.clip(inputs.reshape(-1, 1).astype(jnp.int32),
                        0, n_categories - 1)
    n_tokens = ids_flat.shape[0]

    # Effective tile: sublane-aligned, no bigger than the token count, and at
    # least two grid steps when there is enough work so the "parallel" grid
    # axis can shard across v7x's two TensorCores (1 TC on v5e/v6e: harmless).
    tile_eff = max(8, min(int(tile_n), _round_up(n_tokens, 8)))
    if n_tokens > 16:
        tile_eff = min(tile_eff, _round_up(-(-n_tokens // 2), 8))
    n_tiles = -(-n_tokens // tile_eff)          # cdiv

    # VMEM budget: double-buffered table + ids + out tiles, plus the one-hot
    # intermediate.  The resident-table design only makes sense when it fits.
    itemsize = compute_dtype.itemsize
    vmem_bytes = (2 * n_categories * dim * itemsize      # table (double-buffered)
                  + 2 * tile_eff * 1 * 4                 # ids tiles
                  + 2 * tile_eff * dim * itemsize        # out tiles
                  + tile_eff * n_categories * 4)         # one-hot intermediate
    if vmem_bytes > (48 << 20):
        # TODO(synk): large-table path — scalar-prefetched ids + per-row DMA
        # gather from a memory_space=pl.ANY table (required for v7x's 64 MiB).
        raise NotImplementedError(
            "category table too large for the VMEM-resident one-hot kernel")
    vmem_limit = int(min(max(32 << 20, 2 * vmem_bytes), 64 << 20))

    cost = pl.CostEstimate(
        flops=int(2 * n_tokens * n_categories * dim),
        transcendentals=0,
        bytes_accessed=int(n_tokens * 4
                           + n_categories * dim * itemsize
                           + n_tokens * dim * itemsize),
    )

    # No token padding and no post-kernel slice: output is exactly
    # (n_tokens, dim); Pallas masks the partial last block's writeback, so the
    # garbage ids in the padded read region never reach HBM.
    out_flat = pl.pallas_call(
        _embed_kernel,
        out_shape=jax.ShapeDtypeStruct((n_tokens, dim), compute_dtype),
        grid_spec=pltpu.PrefetchScalarGridSpec(
            num_scalar_prefetch=0,
            grid=(n_tiles,),
            in_specs=[
                pl.BlockSpec((tile_eff, 1), lambda i: (i, 0)),
                # Constant index_map: the table block never changes, so Pallas
                # keeps it resident and skips re-DMA across grid steps.
                pl.BlockSpec((n_categories, dim), lambda i: (0, 0)),
            ],
            out_specs=pl.BlockSpec((tile_eff, dim), lambda i: (i, 0)),
        ),
        compiler_params=pltpu.CompilerParams(
            dimension_semantics=("parallel",),
            vmem_limit_bytes=vmem_limit,
        ),
        cost_estimate=cost,
    )(ids_flat, table)

    return out_flat.reshape(*inputs.shape, dim)


if __name__ == "__main__":
    # Shapes chosen so dim = pattern_length*symbol_dim + augment_dim = 128
    # (lane-dense output stores) and n_tokens = 1024 -> grid of 2 tiles of 512
    # (>= 2 parallel steps for v7x's two TensorCores).
    n_categories = 16
    n_symbols = 8
    pattern_length = 3
    symbol_dim = 32
    augment_dim = 32
    batch, seq = 8, 128

    key = jax.random.PRNGKey(0)
    k_sym, k_aug, k_in = jax.random.split(key, 3)

    # Deterministic parameter init (the module's init_weights is an empty stub).
    symbols = jax.random.normal(k_sym, (n_symbols, symbol_dim), jnp.float32) / jnp.sqrt(
        jnp.float32(symbol_dim)
    )
    augments = jax.random.normal(k_aug, (n_categories, augment_dim), jnp.float32) / jnp.sqrt(
        jnp.float32(augment_dim)
    )
    # Deterministic pattern: category c uses symbols (c, c+1, ..., c+P-1) mod n_symbols.
    pattern = (
        jnp.arange(n_categories, dtype=jnp.int32)[:, None]
        + jnp.arange(pattern_length, dtype=jnp.int32)[None, :]
    ) % n_symbols

    inputs = jax.random.randint(k_in, (batch, seq), 0, n_categories, dtype=jnp.int32)

    out = symbolic_embeddings_forward(inputs, symbols, pattern, augments)
    out = jax.block_until_ready(out)

    # Pure-JAX reference for the same semantics.
    ref_embeds = symbols[pattern][inputs].reshape(batch, seq, -1)
    ref = jnp.concatenate([ref_embeds, augments[inputs]], axis=-1)

    expected_dim = pattern_length * symbol_dim + augment_dim
    assert out.shape == (batch, seq, expected_dim), out.shape
    assert jnp.allclose(out, ref, atol=1e-5), "kernel output mismatch vs reference"

    print("KERNEL_OK")
</pallas_src>

<mosaic_0001>
module attributes {stable_mosaic.version = 11 : i64} {
  func.func @_embed_kernel(%arg0: i32, %arg1: memref<512x1xi32, #tpu.memory_space<vmem>>, %arg2: memref<16x128xf32, #tpu.memory_space<vmem>>, %arg3: memref<512x128xf32, #tpu.memory_space<vmem>>) attributes {dimension_semantics = [#tpu.dimension_semantics<parallel>], iteration_bounds = array<i64: 2>, scalar_prefetch = 0 : i64, scratch_operands = 0 : i64, tpu.core_type = #tpu.core_type<tc>, window_params = [{transform_indices = @transform_0, window_bounds = array<i64: 512, 1>}, {pipeline_mode = #tpu.pipeline_mode<synchronous>, transform_indices = @transform_1, window_bounds = array<i64: 16, 128>}, {transform_indices = @transform_2, window_bounds = array<i64: 512, 128>}]} {
    %c0 = arith.constant 0 : index
    %c0_0 = arith.constant 0 : index
    %0 = vector.load %arg1[%c0, %c0_0] : memref<512x1xi32, #tpu.memory_space<vmem>>, vector<512x1xi32>
    %c0_1 = arith.constant 0 : index
    %c0_2 = arith.constant 0 : index
    %1 = vector.load %arg2[%c0_1, %c0_2] : memref<16x128xf32, #tpu.memory_space<vmem>>, vector<16x128xf32>
    %2 = tpu.iota {dimensions = array<i32: 1>} : vector<512x16xi32>
    %3 = vector.broadcast %0 : vector<512x1xi32> to vector<512x16xi32>
    %4 = arith.cmpi eq, %3, %2 : vector<512x16xi32>
    %5 = arith.extui %4 : vector<512x16xi1> to vector<512x16xi32>
    %6 = arith.sitofp %5 : vector<512x16xi32> to vector<512x16xf32>
    %cst = arith.constant dense<0.000000e+00> : vector<512x128xf32>
    %7 = tpu.matmul %6, %1, %cst {dimension_numbers = #tpu.dot_dimension_numbers<[1], [0], [0], [1], [0, 0, 1, 1], [], []>, precision = #tpu.contract_precision<fp32>} : vector<512x16xf32>, vector<16x128xf32>, vector<512x128xf32> -> vector<512x128xf32>
    %c0_3 = arith.constant 0 : index
    %c0_4 = arith.constant 0 : index
    %8 = vector.load %arg3[%c0_3, %c0_4] : memref<512x128xf32, #tpu.memory_space<vmem>>, vector<512x128xf32>
    tpu.vector_store %arg3[%c0_3, %c0_4], %7 {strides = array<i32>} : memref<512x128xf32, #tpu.memory_space<vmem>>, vector<512x128xf32>,
    return
  }
  func.func @transform_0(%arg0: i32) -> (i32, i32) {
    %c0_i32 = arith.constant 0 : i32
    %c0_i32_0 = arith.constant 0 : i32
    return %arg0, %c0_i32 : i32, i32
  }
  func.func @transform_1(%arg0: i32) -> (i32, i32) {
    %c0_i32 = arith.constant 0 : i32
    %c0_i32_0 = arith.constant 0 : i32
    %c0_i32_1 = arith.constant 0 : i32
    return %c0_i32, %c0_i32_0 : i32, i32
  }
  func.func @transform_2(%arg0: i32) -> (i32, i32) {
    %c0_i32 = arith.constant 0 : i32
    %c0_i32_0 = arith.constant 0 : i32
    return %arg0, %c0_i32 : i32, i32
  }
}

</mosaic_0001>

<bundles_post_ra>
// kernel: tpu_custom_call.1
= control target key start
LH: loop header
LB: loop body
LE: loop exit
PB: predicated region body
PF: predicated region fallthrough
CT: control target
= control target key end

     0   :  { %7 = vsyncpa [#allocation3], 0  ;;  %s7197_s0 = inlined_call_operand.vmem [shape: s32[1024,1], index: 0, kind: input, shape index: {}]   ;;  %s7198_s1 = inlined_call_operand.vmem [shape: f32[16,128], index: 1, kind: input, shape index: {}]   ;;  %s7199_s2 = inlined_call_operand.hbm [shape: f32[1024,128], index: 2, kind: output, shape index: {}]  }
   0x1   :  { %9 = vsyncpa [#allocation3 + $0x1], 0  ;;  %s5836_s9 = smov 0   ;;  %s5838_s10 = smov 0  }
   0x2   :  { %s5840_s11 = smov 0   ;;  %s5842_s12 = smov 0  }
   0x3 LB: > { %s5857_s13 = sadd.s32 4294967295, %s5814_s12   ;;  %s4098_s14 = sadd.s32 4294967294, %s5814_s12   ;;  %s5814_s12 = sphi %s5842_s12, %s7491_s12   ;;  %s5810_s11 = sphi %s5840_s11, %s7490_s11   ;;  %s5806_s10 = sphi %s5838_s10, %s7489_s10   ;;  %s5802_s9 = sphi %s5836_s9, %s7488_s9  }
   0x4   : > { %s5861_s15 = sadd.s32 1, %s5814_s12   ;;  %s69_s16 = sadd.s32 1, %s5810_s11 }
   0x5   : > { %s66_s17 = ssub.s32 %s5814_s12, %s5861_s15  ;;  %p79_p0 = scmp.ne.s32.totalorder %s5810_s11, %s5806_s10 }
   0x6   : > { %p67_p1 = scmp.eq.s32.totalorder %s66_s17, 0  ;;  %p80_p2 = scmp.eq.s32.totalorder %s5857_s13, 1 }
   0x7   : > { %p85_p3 = scmp.ne.s32.totalorder %s5806_s10, %s5802_s9  ;;  %p86_p4 = scmp.eq.s32.totalorder %s4098_s14, 1 }
   0x8   : > { %s5872_s18 = scalar_select %p67_p1, %s5810_s11, %s69_s16  }
   0x9   : > { %p5874_p5 = por %p80_p2, %p79_p0  ;;  %p5878_p6 = por %p86_p4, %p85_p3 }
   0xa   : > { %p4101_p7 = scmp.ge.s32.totalorder %s5814_s12, 1  ;;  %p116_p8 = scmp.lt.s32.totalorder %s5814_s12, 3 }
   0xc   : > { %p117_p9 = pnand %p4101_p7, %p116_p8 }
   0xe   : > { %120 = sbr.rel (%p117_p9) target bundleno = 781 (0x30d), region = 28 }
  0x15   : > { %s4103_s21 = sshll.u32 %s5857_s13, 6  ;;  %v5816_v0 = vmov 0   ;;  %v209_v13 = vld [vmem:[%s7198_s1] sm:$0xff]  ;;  %v210_v14 = vld [vmem:[%s7198_s1 + $0x8] sm:$0xff]  ;;  %vm597_vm0 = vcmask 130048   ;;  %s135_s30 = sand.u32 1, %s5806_s10  }
  0x16   : > { %5751 = vset.pattern.permute.xlu1 %v5816_v0  ;;  %5750 = vset.pattern.permute.xlu0 %v5816_v0  ;;  %p139_p10 = scmp.lt.s32.totalorder %s4103_s21, 127  ;;  %v791_v17 = vand.u32 4294901760, %v209_v13  ;;  %v794_v18 = vand.u32 4294901760, %v210_v14  ;;  %s4102_s3 = sshll.u32 %s135_s30, 9 }
  0x17   : > { %s7079_s4 = scalar_lea.vmem [#allocation2], %s4102_s3  ;;  %s4366_s5 = sshll.u32 %s5857_s13, 13 }
  0x18   : > { %s7493_s21 = smov (!%p139_p10, %s4103_s21), 127  ;;  %v5910_v19 = vpack.c.bf16 %v794_v18, %v791_v17  ;;  %v5912_v20 = vsub.f32 %v209_v13, %v791_v17  ;;  %v5914_v21 = vsub.f32 %v210_v14, %v794_v18  ;;  %v211_v14 = vlaneseq  ;;  %s4036_s6 = sshll.u32 %s7079_s4, 4  ;;  %s7150_s6 = int_to_ptr.vmem [resolvable:$true] %s4036_s6 }
  0x19   : > { %s4104_s22 = sshll.u32 %s7493_s21, 3  ;;  %s7148_s14 = scalar_lea.hbm %s7199_s2, %s4366_s5 }
  0x1a   : > { %s5888_s25 = scalar_lea.vmem %s7197_s0, %s4104_s22  ;;  %5376 = vmatprep.subr.bf16.mxu0 %v5910_v19  ;;  %5364 = vmatprep.subr.bf16.mxu1 %v5910_v19  ;;  %v1500_v24 = vand.u32 4294901760, %v5912_v20  ;;  %v1507_v25 = vand.u32 4294901760, %v5914_v21  ;;  %v5980_v17 = vand.u32 127, %v211_v14  ;;  %s7156_s13 = scalar_lea.sflag [#allocation3], %s135_s30 }
  0x1b   : > { %v147_v1 = vld [vmem:[%s5888_s25 + $0x10] sm:$0xff]  ;;  %v145_v2 = vld [vmem:[%s5888_s25] sm:$0xff]  ;;  %v148_v3 = vld [vmem:[%s5888_s25 + $0x18] sm:$0xff]  ;;  %5378 = vmatpush3.bf16.msra.mxu0 %v5910_v19  ;;  %5366 = vmatpush3.bf16.msra.mxu1 %v5910_v19  ;;  %s5752_s16 = scalar_lea.vmem %s7150_s6, 8192  ;;  %s5818_s17 = smov [#allocation2]  }
  0x1c   : > { %220 = vperm.xlu1 %5751, %v147_v1   ;;  %214 = vperm.xlu0 %5750, %v145_v2   ;;  %v146_v4 = vld [vmem:[%s5888_s25 + $0x8] sm:$0xff]  ;;  %v149_v6 = vld [vmem:[%s5888_s25 + $0x20] sm:$0xff]  ;;  %v152_v7 = vld [vmem:[%s5888_s25 + $0x38] sm:$0xff]  ;;  %v1501_v26 = vsub.f32 %v5912_v20, %v1500_v24  ;;  %v1508_v27 = vsub.f32 %v5914_v21, %v1507_v25  ;;  %v5926_v28 = vpack.c.bf16 %v1507_v25, %v1500_v24  ;;  %p5753_p11 = scmp.ne.s32.totalorder %s7150_s6, %s5752_s16  ;;  %s5756_s21 = sshll.u32 %s5818_s17, 4  ;;  %s5757_s21 = int_to_ptr.vmem [resolvable:$false] %s5756_s21 }
  0x1d   : > { %v150_v5 = vld [vmem:[%s5888_s25 + $0x28] sm:$0xff]  ;;  %v151_v8 = vld [vmem:[%s5888_s25 + $0x30] sm:$0xff]  ;;  %v153_v10 = vld [vmem:[%s5888_s25 + $0x40] sm:$0xff]  ;;  %s5758_s22 = scalar_lea.vmem %s5757_s21, 16384  ;;  %p5759_p0 = scmp.lt.s32.totalorder %s7150_s6, %s5757_s21 }
  0x1e   : > { %v154_v9 = vld [vmem:[%s5888_s25 + $0x48] sm:$0xff]  ;;  %v156_v11 = vld [vmem:[%s5888_s25 + $0x58] sm:$0xff]  ;;  %v155_v12 = vld [vmem:[%s5888_s25 + $0x50] sm:$0xff]  ;;  %v1502_v31 = vand.u32 4294901760, %v1501_v26  ;;  %v1509_v32 = vand.u32 4294901760, %v1508_v27  ;;  %5380 = vmatprep.subr.bf16.mxu0 %v5926_v28  ;;  %p5754_p12 = pnand %p5753_p11, %p5874_p5  ;;  %p5760_p1 = scmp.lt.s32.totalorder %s5758_s22, %s5752_s16 }
  0x1f   : > { %v158_v15 = vld [vmem:[%s5888_s25 + $0x68] sm:$0xff]  ;;  %v157_v16 = vld [vmem:[%s5888_s25 + $0x60] sm:$0xff]  ;;  %v160_v22 = vld [vmem:[%s5888_s25 + $0x78] sm:$0xff] }
  0x20   : > { %223 = vperm.xlu1 %5751, %v148_v3   ;;  %217 = vperm.xlu0 %5750, %v146_v4   ;;  %v159_v23 = vld [vmem:[%s5888_s25 + $0x70] sm:$0xff]  ;;  %v162_v29 = vld [vmem:[%s5888_s25 + $0x88] sm:$0xff]  ;;  %v161_v30 = vld [vmem:[%s5888_s25 + $0x80] sm:$0xff]  ;;  %v5931_v33 = vpack.c.bf16 %v1509_v32, %v1502_v31  ;;  %p5755_p13 = pneg %p5754_p12  ;;  %p5761_p2 = por %p5760_p1, %p5759_p0 }
  0x21   : > { %v164_v34 = vld [vmem:[%s5888_s25 + $0x98] sm:$0xff]  ;;  %v163_v35 = vld [vmem:[%s5888_s25 + $0x90] sm:$0xff]  ;;  %v166_v36 = vld [vmem:[%s5888_s25 + $0xa8] sm:$0xff] }
  0x22   : > { %5368 = vmatprep.subr.bf16.mxu1 %v5931_v33  ;;  %v165_v37 = vld [vmem:[%s5888_s25 + $0xa0] sm:$0xff]  ;;  %v168_v38 = vld [vmem:[%s5888_s25 + $0xb8] sm:$0xff]  ;;  %v167_v39 = vld [vmem:[%s5888_s25 + $0xb0] sm:$0xff]  ;;  %p5762_p3 = pnand %p5761_p2, %p5755_p13 }
  0x23   : > { %v170_v40 = vld [vmem:[%s5888_s25 + $0xc8] sm:$0xff]  ;;  %v169_v41 = vld [vmem:[%s5888_s25 + $0xc0] sm:$0xff]  ;;  %v172_v42 = vld [vmem:[%s5888_s25 + $0xd8] sm:$0xff] }
  0x24   : > { %229 = vperm.xlu1 %5751, %v150_v5   ;;  %226 = vperm.xlu0 %5750, %v149_v6   ;;  %v171_v43 = vld [vmem:[%s5888_s25 + $0xd0] sm:$0xff]  ;;  %v174_v44 = vld [vmem:[%s5888_s25 + $0xe8] sm:$0xff]  ;;  %v173_v45 = vld [vmem:[%s5888_s25 + $0xe0] sm:$0xff] }
  0x25   : > { %v176_v46 = vld [vmem:[%s5888_s25 + $0xf8] sm:$0xff]  ;;  %v175_v47 = vld [vmem:[%s5888_s25 + $0xf0] sm:$0xff]  ;;  %v178_v48 = vld [vmem:[%s5888_s25 + $0x108] sm:$0xff] }
  0x26   : > { %v177_v49 = vld [vmem:[%s5888_s25 + $0x100] sm:$0xff]  ;;  %v180_v50 = vld [vmem:[%s5888_s25 + $0x118] sm:$0xff]  ;;  %v179_v51 = vld [vmem:[%s5888_s25 + $0x110] sm:$0xff] }
  0x27   : > { %v182_v52 = vld [vmem:[%s5888_s25 + $0x128] sm:$0xff]  ;;  %v181_v53 = vld [vmem:[%s5888_s25 + $0x120] sm:$0xff]  ;;  %v184_v54 = vld [vmem:[%s5888_s25 + $0x138] sm:$0xff] }
  0x28   : > { %235 = vperm.xlu1 %5751, %v152_v7   ;;  %232 = vperm.xlu0 %5750, %v151_v8   ;;  %v183_v55 = vld [vmem:[%s5888_s25 + $0x130] sm:$0xff]  ;;  %v186_v56 = vld [vmem:[%s5888_s25 + $0x148] sm:$0xff]  ;;  %v185_v57 = vld [vmem:[%s5888_s25 + $0x140] sm:$0xff] }
  0x29   : > { %v188_v58 = vld [vmem:[%s5888_s25 + $0x158] sm:$0xff]  ;;  %v187_v59 = vld [vmem:[%s5888_s25 + $0x150] sm:$0xff]  ;;  %v190_v60 = vld [vmem:[%s5888_s25 + $0x168] sm:$0xff] }
  0x2a   : > { %v189_v61 = vld [vmem:[%s5888_s25 + $0x160] sm:$0xff]  ;;  %v192_v62 = vld [vmem:[%s5888_s25 + $0x178] sm:$0xff]  ;;  %v191_v63 = vld [vmem:[%s5888_s25 + $0x170] sm:$0xff] }
  0x2b   : > { %v194_v0 = vld [vmem:[%s5888_s25 + $0x188] sm:$0xff]  ;;  %v193_v1 = vld [vmem:[%s5888_s25 + $0x180] sm:$0xff]  ;;  %v196_v2 = vld [vmem:[%s5888_s25 + $0x198] sm:$0xff] }
  0x2c   : > { %241 = vperm.xlu1 %5751, %v154_v9   ;;  %238 = vperm.xlu0 %5750, %v153_v10   ;;  %v195_v3 = vld [vmem:[%s5888_s25 + $0x190] sm:$0xff]  ;;  %v198_v4 = vld [vmem:[%s5888_s25 + $0x1a8] sm:$0xff]  ;;  %v197_v5 = vld [vmem:[%s5888_s25 + $0x1a0] sm:$0xff] }
  0x2d   : > { %v200_v6 = vld [vmem:[%s5888_s25 + $0x1b8] sm:$0xff]  ;;  %v199_v7 = vld [vmem:[%s5888_s25 + $0x1b0] sm:$0xff]  ;;  %v202_v8 = vld [vmem:[%s5888_s25 + $0x1c8] sm:$0xff] }
  0x2e   : > { %v201_v9 = vld [vmem:[%s5888_s25 + $0x1c0] sm:$0xff]  ;;  %v204_v10 = vld [vmem:[%s5888_s25 + $0x1d8] sm:$0xff] }
  0x2f   : > { %v205_v13 = vld [vmem:[%s5888_s25 + $0x1e0] sm:$0xff] }
  0x30   : > { %247 = vperm.xlu1 %5751, %v156_v11   ;;  %244 = vperm.xlu0 %5750, %v155_v12   ;;  %v203_v11 = vld [vmem:[%s5888_s25 + $0x1d0] sm:$0xff]  ;;  %v206_v12 = vld [vmem:[%s5888_s25 + $0x1e8] sm:$0xff] }
  0x34   : > { %253 = vperm.xlu1 %5751, %v158_v15   ;;  %250 = vperm.xlu0 %5750, %v157_v16   ;;  %v208_v15 = vld [vmem:[%s5888_s25 + $0x1f8] sm:$0xff]  ;;  %v207_v16 = vld [vmem:[%s5888_s25 + $0x1f0] sm:$0xff] }
  0x38   : > { %259 = vperm.xlu1 %5751, %v160_v22   ;;  %256 = vperm.xlu0 %5750, %v159_v23   ;;  %v7200_v23 = vmov 0.0  }
  0x3c   : > { %265 = vperm.xlu1 %5751, %v162_v29   ;;  %262 = vperm.xlu0 %5750, %v161_v30  }
  0x40   : > { %271 = vperm.xlu1 %5751, %v164_v34   ;;  %268 = vperm.xlu0 %5750, %v163_v35  }
  0x44   : > { %277 = vperm.xlu1 %5751, %v166_v36   ;;  %274 = vperm.xlu0 %5750, %v165_v37  }
  0x48   : > { %283 = vperm.xlu1 %5751, %v168_v38   ;;  %280 = vperm.xlu0 %5750, %v167_v39  }
  0x4c   : > { %289 = vperm.xlu1 %5751, %v170_v40   ;;  %286 = vperm.xlu0 %5750, %v169_v41  }
  0x50   : > { %295 = vperm.xlu1 %5751, %v172_v42   ;;  %292 = vperm.xlu0 %5750, %v171_v43  }
  0x54   : > { %301 = vperm.xlu1 %5751, %v174_v44   ;;  %298 = vperm.xlu0 %5750, %v173_v45  }
  0x58   : > { %307 = vperm.xlu1 %5751, %v176_v46   ;;  %304 = vperm.xlu0 %5750, %v175_v47  }
  0x5c   : > { %313 = vperm.xlu1 %5751, %v178_v48   ;;  %310 = vperm.xlu0 %5750, %v177_v49  }
  0x60   : > { %319 = vperm.xlu1 %5751, %v180_v50   ;;  %316 = vperm.xlu0 %5750, %v179_v51  }
  0x64   : > { %325 = vperm.xlu1 %5751, %v182_v52   ;;  %322 = vperm.xlu0 %5750, %v181_v53  }
  0x68   : > { %331 = vperm.xlu1 %5751, %v184_v54   ;;  %328 = vperm.xlu0 %5750, %v183_v55  }
  0x6c   : > { %337 = vperm.xlu1 %5751, %v186_v56   ;;  %334 = vperm.xlu0 %5750, %v185_v57  }
  0x70   : > { %343 = vperm.xlu1 %5751, %v188_v58   ;;  %340 = vperm.xlu0 %5750, %v187_v59  }
  0x74   : > { %349 = vperm.xlu1 %5751, %v190_v60   ;;  %346 = vperm.xlu0 %5750, %v189_v61  }
  0x78   : > { %355 = vperm.xlu1 %5751, %v192_v62   ;;  %352 = vperm.xlu0 %5750, %v191_v63  }
  0x7c   : > { %361 = vperm.xlu1 %5751, %v194_v0   ;;  %358 = vperm.xlu0 %5750, %v193_v1  }
  0x80   : > { %367 = vperm.xlu1 %5751, %v196_v2   ;;  %364 = vperm.xlu0 %5750, %v195_v3  }
  0x84   : > { %373 = vperm.xlu1 %5751, %v198_v4   ;;  %370 = vperm.xlu0 %5750, %v197_v5  }
  0x88   : > { %379 = vperm.xlu1 %5751, %v200_v6   ;;  %376 = vperm.xlu0 %5750, %v199_v7  }
  0x8c   : > { %385 = vperm.xlu1 %5751, %v202_v8   ;;  %382 = vperm.xlu0 %5750, %v201_v9  }
  0x90   : > { %391 = vperm.xlu1 %5751, %v204_v10   ;;  %388 = vperm.xlu0 %5750, %v203_v11  }
  0x94   : > { %397 = vperm.xlu1 %5751, %v206_v12   ;;  %394 = vperm.xlu0 %5750, %v205_v13  }
  0x98   : > { %403 = vperm.xlu1 %5751, %v208_v15   ;;  %400 = vperm.xlu0 %5750, %v207_v16  }
  0x9b   : > { %v221_v18 = vpop.permute.xlu1 %220  ;;  %v215_v22 = vpop.permute.xlu0 %214 }
  0x9c   : > { %vm407_vm1 = vcmp.eq.s32.totalorder %v221_v18, %v5980_v17  ;;  %vm405_vm2 = vcmp.eq.s32.totalorder %v215_v22, %v5980_v17 }
  0x9d   : > { %v5985_v24 = vsel %vm407_vm1, 1.0, %v7200_v23  ;;  %v5988_v25 = vsel %vm405_vm2, 1.0, %v7200_v23 }
  0x9e   : > { %v605_v26 = vsel %vm597_vm0, %v5985_v24, 0  ;;  %v599_v27 = vsel %vm597_vm0, %v5988_v25, 0 }
  0x9f   : > { %v5994_v29 = vsub.f32 %v605_v26, %v605_v26  ;;  %v5996_v30 = vsub.f32 %v599_v27, %v599_v27  ;;  %v224_v31 = vpop.permute.xlu1 %223  ;;  %v218_v32 = vpop.permute.xlu0 %217 }
  0xa0   : > { %vm408_vm3 = vcmp.eq.s32.totalorder %v224_v31, %v5980_v17  ;;  %vm406_vm4 = vcmp.eq.s32.totalorder %v218_v32, %v5980_v17 }
  0xa1   : > { %7313 = vst [vmem:[#allocation5_spill] sm:$0xff] %v5994_v29  ;;  %7314 = vst [vmem:[#allocation6_spill] sm:$0xff] %v5996_v30  ;;  %v6001_v34 = vsel %vm408_vm3, 1.0, %v7200_v23  ;;  %v6004_v35 = vsel %vm406_vm4, 1.0, %v7200_v23  ;;  %v859_v36 = vand.u32 4294901760, %v5996_v30  ;;  %v879_v39 = vand.u32 4294901760, %v5994_v29 }
  0xa2   : > { %v608_v37 = vsel %vm597_vm0, %v6001_v34, 0  ;;  %v602_v38 = vsel %vm597_vm0, %v6004_v35, 0 }
  0xa3   : > { %v6012_v40 = vsub.f32 %v608_v37, %v608_v37  ;;  %v6014_v41 = vsub.f32 %v602_v38, %v602_v38  ;;  %v230_v42 = vpop.permute.xlu1 %229  ;;  %5067 = vmatprep.mubr.f32.mxu0 %v859_v36  ;;  %v227_v43 = vpop.permute.xlu0 %226  ;;  %v860_v44 = vsub.f32 %v5996_v30, %v859_v36  ;;  %v880_v52 = vsub.f32 %v5994_v29, %v879_v39 }
  0xa4   : > { %vm410_vm5 = vcmp.eq.s32.totalorder %v230_v42, %v5980_v17  ;;  %vm409_vm6 = vcmp.eq.s32.totalorder %v227_v43, %v5980_v17 }
  0xa5   : > { %7315 = vst [vmem:[#allocation7_spill] sm:$0xff] %v6012_v40  ;;  %7316 = vst [vmem:[#allocation8_spill] sm:$0xff] %v6014_v41  ;;  %v6020_v45 = vsel %vm410_vm5, 1.0, %v7200_v23  ;;  %v6023_v46 = vsel %vm409_vm6, 1.0, %v7200_v23  ;;  %v861_v47 = vand.u32 4294901760, %v860_v44  ;;  %v869_v48 = vand.u32 4294901760, %v6014_v41 }
  0xa6   : > { %v614_v49 = vsel %vm597_vm0, %v6020_v45, 0  ;;  %v611_v50 = vsel %vm597_vm0, %v6023_v46, 0  ;;  %v889_v51 = vand.u32 4294901760, %v6012_v40 }
  0xa7   : > { %v6032_v53 = vsub.f32 %v614_v49, %v614_v49  ;;  %v6034_v54 = vsub.f32 %v611_v50, %v611_v50  ;;  %v236_v55 = vpop.permute.xlu1 %235  ;;  %4767 = vmatprep.mubr.f32.mxu1 %v861_v47  ;;  %5068 = vmatmul.mubr.f32.vlgmr.msra.gmra.mrb[0].mxu0 %v869_v48  ;;  %v233_v56 = vpop.permute.xlu0 %232  ;;  %v870_v57 = vsub.f32 %v6014_v41, %v869_v48 }
  0xa8   : > { %vm412_vm7 = vcmp.eq.s32.totalorder %v236_v55, %v5980_v17  ;;  %vm411_vm8 = vcmp.eq.s32.totalorder %v233_v56, %v5980_v17  ;;  %5070 = vmatprep.mubr.f32.mxu0 %v879_v39  ;;  %5382 = vmatpush3.bf16.msra.mxu0 %v5926_v28  ;;  %v890_v58 = vsub.f32 %v6012_v40, %v889_v51  ;;  %v881_v28 = vand.u32 4294901760, %v880_v52 }
  0xa9   : > { %7317 = vst [vmem:[#allocation9_spill] sm:$0xff] %v6032_v53  ;;  %7318 = vst [vmem:[#allocation10_spill] sm:$0xff] %v6034_v54  ;;  %v6042_v59 = vsel %vm412_vm7, 1.0, %v7200_v23  ;;  %v6045_v60 = vsel %vm411_vm8, 1.0, %v7200_v23  ;;  %v871_v61 = vand.u32 4294901760, %v870_v57  ;;  %v899_v62 = vand.u32 4294901760, %v6034_v54  ;;  %5384 = vmatprep.subr.bf16.mxu0 %v5910_v19 }
  0xaa   : > { %v620_v63 = vsel %vm597_vm0, %v6042_v59, 0  ;;  %v617_v0 = vsel %vm597_vm0, %v6045_v60, 0  ;;  %v909_v1 = vand.u32 4294901760, %v6032_v53  ;;  %v891_v7 = vand.u32 4294901760, %v890_v58 }
  0xab   : > { %v6054_v2 = vsub.f32 %v620_v63, %v620_v63  ;;  %v6056_v3 = vsub.f32 %v617_v0, %v617_v0  ;;  %v242_v4 = vpop.permute.xlu1 %241  ;;  %4768 = vmatmul.mubr.f32.vlgmr.msra.gmra.mrb[0].mxu1 %v871_v61  ;;  %5071 = vmatmul.mubr.f32.gmra.mrb[2].mxu0 %v889_v51  ;;  %v239_v5 = vpop.permute.xlu0 %238  ;;  %v900_v6 = vsub.f32 %v6034_v54, %v899_v62 }
  0xac   : > { %vm414_vm9 = vcmp.eq.s32.totalorder %v242_v4, %v5980_v17  ;;  %5370 = vmatpush3.bf16.msra.mxu1 %v5931_v33  ;;  %vm413_vm10 = vcmp.eq.s32.totalorder %v239_v5, %v5980_v17  ;;  %4770 = vmatprep.mubr.f32.mxu1 %v881_v28  ;;  %v910_v8 = vsub.f32 %v6032_v53, %v909_v1 }
  0xad   : > { %7319 = vst [vmem:[#allocation11_spill] sm:$0xff] %v6054_v2  ;;  %7320 = vst [vmem:[#allocation12_spill] sm:$0xff] %v6056_v3  ;;  %v6064_v9 = vsel %vm414_vm9, 1.0, %v7200_v23  ;;  %v6067_v10 = vsel %vm413_vm10, 1.0, %v7200_v23  ;;  %5073 = vmatprep.mubr.f32.mxu0 %v899_v62  ;;  %v901_v11 = vand.u32 4294901760, %v900_v6  ;;  %v919_v12 = vand.u32 4294901760, %v6056_v3 }
  0xae   : > { %v626_v13 = vsel %vm597_vm0, %v6064_v9, 0  ;;  %v623_v33 = vsel %vm597_vm0, %v6067_v10, 0  ;;  %v929_v14 = vand.u32 4294901760, %v6054_v2  ;;  %v911_v27 = vand.u32 4294901760, %v910_v8 }
  0xaf   : > { %v6075_v15 = vsub.f32 %v626_v13, %v626_v13  ;;  %v6077_v16 = vsub.f32 %v623_v33, %v623_v33  ;;  %v248_v18 = vpop.permute.xlu1 %247  ;;  %4771 = vmatmul.mubr.f32.gmra.mrb[2].mxu1 %v891_v7  ;;  %5074 = vmatmul.mubr.f32.gmra.mrb[4].mxu0 %v909_v1  ;;  %v245_v22 = vpop.permute.xlu0 %244  ;;  %v920_v26 = vsub.f32 %v6056_v3, %v919_v12 }
  0xb0   : > { %vm416_vm11 = vcmp.eq.s32.totalorder %v248_v18, %v5980_v17  ;;  %vm415_vm12 = vcmp.eq.s32.totalorder %v245_v22, %v5980_v17  ;;  %4773 = vmatprep.mubr.f32.mxu1 %v901_v11  ;;  %5076 = vmatprep.mubr.f32.mxu0 %v919_v12  ;;  %v930_v31 = vsub.f32 %v6054_v2, %v929_v14 }
  0xb1   : > { %7321 = vst [vmem:[#allocation13_spill] sm:$0xff] %v6075_v15  ;;  %7322 = vst [vmem:[#allocation14_spill] sm:$0xff] %v6077_v16  ;;  %v6084_v32 = vsel %vm416_vm11, 1.0, %v7200_v23  ;;  %v6087_v36 = vsel %vm415_vm12, 1.0, %v7200_v23  ;;  %v921_v37 = vand.u32 4294901760, %v920_v26  ;;  %v939_v38 = vand.u32 4294901760, %v6077_v16 }
  0xb2   : > { %v632_v39 = vsel %vm597_vm0, %v6084_v32, 0  ;;  %v629_v42 = vsel %vm597_vm0, %v6087_v36, 0  ;;  %v949_v43 = vand.u32 4294901760, %v6075_v15  ;;  %v931_v51 = vand.u32 4294901760, %v930_v31 }
  0xb3   : > { %v6095_v44 = vsub.f32 %v632_v39, %v632_v39  ;;  %v6097_v47 = vsub.f32 %v629_v42, %v629_v42  ;;  %v254_v48 = vpop.permute.xlu1 %253  ;;  %4774 = vmatmul.mubr.f32.gmra.mrb[4].mxu1 %v911_v27  ;;  %5077 = vmatmul.mubr.f32.gmra.mrb[6].mxu0 %v929_v14  ;;  %v251_v49 = vpop.permute.xlu0 %250  ;;  %v940_v50 = vsub.f32 %v6077_v16, %v939_v38 }
  0xb4   : > { %vm418_vm13 = vcmp.eq.s32.totalorder %v254_v48, %v5980_v17  ;;  %vm417_vm14 = vcmp.eq.s32.totalorder %v251_v49, %v5980_v17  ;;  %4776 = vmatprep.mubr.f32.mxu1 %v921_v37  ;;  %5079 = vmatprep.mubr.f32.mxu0 %v939_v38  ;;  %v950_v52 = vsub.f32 %v6075_v15, %v949_v43 }
  0xb5   : > { %7323 = vst [vmem:[#allocation15_spill] sm:$0xff] %v6095_v44  ;;  %7324 = vst [vmem:[#allocation16_spill] sm:$0xff] %v6097_v47  ;;  %v6104_v55 = vsel %vm418_vm13, 1.0, %v7200_v23  ;;  %v6107_v56 = vsel %vm417_vm14, 1.0, %v7200_v23  ;;  %v941_v57 = vand.u32 4294901760, %v940_v50  ;;  %v959_v58 = vand.u32 4294901760, %v6097_v47 }
  0xb6   : > { %v638_v61 = vsel %vm597_vm0, %v6104_v55, 0  ;;  %v635_v62 = vsel %vm597_vm0, %v6107_v56, 0  ;;  %v969_v63 = vand.u32 4294901760, %v6095_v44  ;;  %v951_v6 = vand.u32 4294901760, %v950_v52 }
  0xb7   : > { %v6115_v0 = vsub.f32 %v638_v61, %v638_v61  ;;  %v6117_v28 = vsub.f32 %v635_v62, %v635_v62  ;;  %v260_v1 = vpop.permute.xlu1 %259  ;;  %4777 = vmatmul.mubr.f32.gmra.mrb[6].mxu1 %v931_v51  ;;  %5080 = vmatmul.mubr.f32.gmra.mrb[8].mxu0 %v949_v43  ;;  %v257_v4 = vpop.permute.xlu0 %256  ;;  %v960_v5 = vsub.f32 %v6097_v47, %v959_v58 }
  0xb8   : > { %vm420_vm15 = vcmp.eq.s32.totalorder %v260_v1, %v5980_v17  ;;  %vm419_vm1 = vcmp.eq.s32.totalorder %v257_v4, %v5980_v17  ;;  %4779 = vmatprep.mubr.f32.mxu1 %v941_v57  ;;  %5082 = vmatprep.mubr.f32.mxu0 %v959_v58  ;;  %v970_v7 = vsub.f32 %v6095_v44, %v969_v63 }
  0xb9   : > { %7325 = vst [vmem:[#allocation17_spill] sm:$0xff] %v6115_v0  ;;  %7326 = vst [vmem:[#allocation18_spill] sm:$0xff] %v6117_v28  ;;  %v6124_v8 = vsel %vm420_vm15, 1.0, %v7200_v23  ;;  %v6127_v11 = vsel %vm419_vm1, 1.0, %v7200_v23  ;;  %v961_v12 = vand.u32 4294901760, %v960_v5  ;;  %v979_v13 = vand.u32 4294901760, %v6117_v28 }
  0xba   : > { %v644_v33 = vsel %vm597_vm0, %v6124_v8, 0  ;;  %v641_v14 = vsel %vm597_vm0, %v6127_v11, 0  ;;  %v989_v18 = vand.u32 4294901760, %v6115_v0  ;;  %v971_v38 = vand.u32 4294901760, %v970_v7 }
  0xbb   : > { %v6135_v22 = vsub.f32 %v644_v33, %v644_v33  ;;  %v6137_v26 = vsub.f32 %v641_v14, %v641_v14  ;;  %v266_v27 = vpop.permute.xlu1 %265  ;;  %4780 = vmatmul.mubr.f32.gmra.mrb[8].mxu1 %v951_v6  ;;  %5083 = vmatmul.mubr.f32.gmra.mrb[10].mxu0 %v969_v63  ;;  %v263_v31 = vpop.permute.xlu0 %262  ;;  %v980_v37 = vsub.f32 %v6117_v28, %v979_v13 }
  0xbc   : > { %vm422_vm2 = vcmp.eq.s32.totalorder %v266_v27, %v5980_v17  ;;  %vm421_vm3 = vcmp.eq.s32.totalorder %v263_v31, %v5980_v17  ;;  %4782 = vmatprep.mubr.f32.mxu1 %v961_v12  ;;  %5085 = vmatprep.mubr.f32.mxu0 %v979_v13  ;;  %v990_v39 = vsub.f32 %v6115_v0, %v989_v18 }
  0xbd   : > { %7327 = vst [vmem:[#allocation19_spill] sm:$0xff] %v6135_v22  ;;  %7328 = vst [vmem:[#allocation20_spill] sm:$0xff] %v6137_v26  ;;  %v6144_v42 = vsel %vm422_vm2, 1.0, %v7200_v23  ;;  %v6147_v43 = vsel %vm421_vm3, 1.0, %v7200_v23  ;;  %v981_v48 = vand.u32 4294901760, %v980_v37  ;;  %v999_v49 = vand.u32 4294901760, %v6137_v26 }
  0xbe   : > { %v650_v50 = vsel %vm597_vm0, %v6144_v42, 0  ;;  %v647_v51 = vsel %vm597_vm0, %v6147_v43, 0  ;;  %v1009_v52 = vand.u32 4294901760, %v6135_v22  ;;  %v991_v1 = vand.u32 4294901760, %v990_v39 }
  0xbf   : > { %v6155_v57 = vsub.f32 %v650_v50, %v650_v50  ;;  %v6157_v58 = vsub.f32 %v647_v51, %v647_v51  ;;  %v272_v61 = vpop.permute.xlu1 %271  ;;  %4783 = vmatmul.mubr.f32.gmra.mrb[10].mxu1 %v971_v38  ;;  %5086 = vmatmul.mubr.f32.gmra.mrb[12].mxu0 %v989_v18  ;;  %v269_v62 = vpop.permute.xlu0 %268  ;;  %v1000_v63 = vsub.f32 %v6137_v26, %v999_v49 }
  0xc0   : > { %vm424_vm4 = vcmp.eq.s32.totalorder %v272_v61, %v5980_v17  ;;  %vm423_vm5 = vcmp.eq.s32.totalorder %v269_v62, %v5980_v17  ;;  %4785 = vmatprep.mubr.f32.mxu1 %v981_v48  ;;  %5088 = vmatprep.mubr.f32.mxu0 %v999_v49  ;;  %v1010_v4 = vsub.f32 %v6135_v22, %v1009_v52 }
  0xc1   : > { %7329 = vst [vmem:[#allocation21_spill] sm:$0xff] %v6155_v57  ;;  %7330 = vst [vmem:[#allocation22_spill] sm:$0xff] %v6157_v58  ;;  %v6164_v5 = vsel %vm424_vm4, 1.0, %v7200_v23  ;;  %v6167_v6 = vsel %vm423_vm5, 1.0, %v7200_v23  ;;  %v1001_v7 = vand.u32 4294901760, %v1000_v63  ;;  %v1019_v12 = vand.u32 4294901760, %v6157_v58 }
  0xc2   : > { %v656_v13 = vsel %vm597_vm0, %v6164_v5, 0  ;;  %v653_v33 = vsel %vm597_vm0, %v6167_v6, 0  ;;  %v1029_v14 = vand.u32 4294901760, %v6155_v57  ;;  %v1011_v39 = vand.u32 4294901760, %v1010_v4 }
  0xc3   : > { %v6175_v18 = vsub.f32 %v656_v13, %v656_v13  ;;  %v6177_v27 = vsub.f32 %v653_v33, %v653_v33  ;;  %v278_v31 = vpop.permute.xlu1 %277  ;;  %4786 = vmatmul.mubr.f32.gmra.mrb[12].mxu1 %v991_v1  ;;  %5089 = vmatmul.mubr.f32.gmra.mrb[14].mxu0 %v1009_v52  ;;  %v275_v37 = vpop.permute.xlu0 %274  ;;  %v1020_v38 = vsub.f32 %v6157_v58, %v1019_v12 }
  0xc4   : > { %vm426_vm6 = vcmp.eq.s32.totalorder %v278_v31, %v5980_v17  ;;  %vm425_vm7 = vcmp.eq.s32.totalorder %v275_v37, %v5980_v17  ;;  %4788 = vmatprep.mubr.f32.mxu1 %v1001_v7  ;;  %5091 = vmatprep.mubr.f32.mxu0 %v1019_v12  ;;  %v1030_v48 = vsub.f32 %v6155_v57, %v1029_v14 }
  0xc5   : > { %7331 = vst [vmem:[#allocation23_spill] sm:$0xff] %v6175_v18  ;;  %7332 = vst [vmem:[#allocation24_spill] sm:$0xff] %v6177_v27  ;;  %v6184_v49 = vsel %vm426_vm6, 1.0, %v7200_v23  ;;  %v6187_v50 = vsel %vm425_vm7, 1.0, %v7200_v23  ;;  %v1021_v51 = vand.u32 4294901760, %v1020_v38  ;;  %v1039_v52 = vand.u32 4294901760, %v6177_v27 }
  0xc6   : > { %v662_v61 = vsel %vm597_vm0, %v6184_v49, 0  ;;  %v659_v62 = vsel %vm597_vm0, %v6187_v50, 0  ;;  %v1049_v63 = vand.u32 4294901760, %v6175_v18  ;;  %v1031_v33 = vand.u32 4294901760, %v1030_v48 }
  0xc7   : > { %v6195_v1 = vsub.f32 %v662_v61, %v662_v61  ;;  %v6197_v4 = vsub.f32 %v659_v62, %v659_v62  ;;  %v284_v7 = vpop.permute.xlu1 %283  ;;  %4789 = vmatmul.mubr.f32.gmra.mrb[14].mxu1 %v1011_v39  ;;  %5092 = vmatmul.mubr.f32.gmra.mrb[16].mxu0 %v1029_v14  ;;  %v281_v12 = vpop.permute.xlu0 %280  ;;  %v1040_v13 = vsub.f32 %v6177_v27, %v1039_v52  ;;  %v7337_v27 = vmov 0.0  }
  0xc8   : > { %vm428_vm8 = vcmp.eq.s32.totalorder %v284_v7, %v5980_v17  ;;  %vm427_vm9 = vcmp.eq.s32.totalorder %v281_v12, %v5980_v17  ;;  %4791 = vmatprep.mubr.f32.mxu1 %v1021_v51  ;;  %5094 = vmatprep.mubr.f32.mxu0 %v1039_v52  ;;  %v1050_v31 = vsub.f32 %v6175_v18, %v1049_v63 }
  0xc9   : > { %7333 = vst [vmem:[#allocation25_spill] sm:$0xff] %v6195_v1  ;;  %7334 = vst [vmem:[#allocation26_spill] sm:$0xff] %v6197_v4  ;;  %v6204_v37 = vsel %vm428_vm8, 1.0, %v7200_v23  ;;  %v6207_v38 = vsel %vm427_vm9, 1.0, %v7200_v23  ;;  %v1041_v39 = vand.u32 4294901760, %v1040_v13  ;;  %v1059_v14 = vand.u32 4294901760, %v6197_v4 }
  0xca   : > { %v668_v61 = vsel %vm597_vm0, %v6204_v37, 0  ;;  %v665_v62 = vsel %vm597_vm0, %v6207_v38, 0  ;;  %v1069_v51 = vand.u32 4294901760, %v6195_v1  ;;  %v1051_v23 = vand.u32 4294901760, %v1050_v31 }
  0xcb   : > { %v6215_v48 = vsub.f32 %v668_v61, %v668_v61  ;;  %v6217_v52 = vsub.f32 %v665_v62, %v665_v62  ;;  %v290_v7 = vpop.permute.xlu1 %289  ;;  %4792 = vmatmul.mubr.f32.gmra.mrb[16].mxu1 %v1031_v33  ;;  %5095 = vmatmul.mubr.f32.gmra.mrb[18].mxu0 %v1049_v63  ;;  %v287_v12 = vpop.permute.xlu0 %286  ;;  %v1060_v13 = vsub.f32 %v6197_v4, %v1059_v14 }
  0xcc   : > { %vm430_vm10 = vcmp.eq.s32.totalorder %v290_v7, %v5980_v17  ;;  %vm429_vm11 = vcmp.eq.s32.totalorder %v287_v12, %v5980_v17  ;;  %4794 = vmatprep.mubr.f32.mxu1 %v1041_v39  ;;  %5097 = vmatprep.mubr.f32.mxu0 %v1059_v14  ;;  %v1070_v18 = vsub.f32 %v6195_v1, %v1069_v51 }
  0xcd   : > { %7335 = vst [vmem:[#allocation27_spill] sm:$0xff] %v6215_v48  ;;  %7336 = vst [vmem:[#allocation28_spill] sm:$0xff] %v6217_v52  ;;  %v6224_v61 = vsel %vm430_vm10, 1.0, %v7337_v27  ;;  %v6227_v62 = vsel %vm429_vm11, 1.0, %v7337_v27  ;;  %v1061_v33 = vand.u32 4294901760, %v1060_v13  ;;  %v1079_v63 = vand.u32 4294901760, %v6217_v52 }
  0xce   : > { %v674_v4 = vsel %vm597_vm0, %v6224_v61, 0  ;;  %v671_v7 = vsel %vm597_vm0, %v6227_v62, 0  ;;  %v1089_v39 = vand.u32 4294901760, %v6215_v48  ;;  %v1071_v57 = vand.u32 4294901760, %v1070_v18 }
  0xcf   : > { %v6235_v31 = vsub.f32 %v674_v4, %v674_v4  ;;  %v6237_v14 = vsub.f32 %v671_v7, %v671_v7  ;;  %v296_v12 = vpop.permute.xlu1 %295  ;;  %4795 = vmatmul.mubr.f32.gmra.mrb[18].mxu1 %v1051_v23  ;;  %5098 = vmatmul.mubr.f32.gmra.mrb[20].mxu0 %v1069_v51  ;;  %v293_v1 = vpop.permute.xlu0 %292  ;;  %v1080_v13 = vsub.f32 %v6217_v52, %v1079_v63 }
  0xd0   : > { %vm432_vm12 = vcmp.eq.s32.totalorder %v296_v12, %v5980_v17  ;;  %vm431_vm13 = vcmp.eq.s32.totalorder %v293_v1, %v5980_v17  ;;  %4797 = vmatprep.mubr.f32.mxu1 %v1061_v33  ;;  %5100 = vmatprep.mubr.f32.mxu0 %v1079_v63  ;;  %v1090_v58 = vsub.f32 %v6215_v48, %v1089_v39 }
  0xd1   : > { %7338 = vst [vmem:[#allocation29_spill] sm:$0xff] %v6235_v31  ;;  %7339 = vst [vmem:[#allocation30_spill] sm:$0xff] %v6237_v14  ;;  %v6244_v4 = vsel %vm432_vm12, 1.0, %v7337_v27  ;;  %v6247_v7 = vsel %vm431_vm13, 1.0, %v7337_v27  ;;  %v1081_v23 = vand.u32 4294901760, %v1080_v13  ;;  %v1099_v51 = vand.u32 4294901760, %v6237_v14 }
  0xd2   : > { %v680_v52 = vsel %vm597_vm0, %v6244_v4, 0  ;;  %v677_v1 = vsel %vm597_vm0, %v6247_v7, 0  ;;  %v1109_v33 = vand.u32 4294901760, %v6235_v31  ;;  %v1091_v22 = vand.u32 4294901760, %v1090_v58 }
  0xd3   : > { %v6255_v18 = vsub.f32 %v680_v52, %v680_v52  ;;  %v6257_v63 = vsub.f32 %v677_v1, %v677_v1  ;;  %v302_v12 = vpop.permute.xlu1 %301  ;;  %4798 = vmatmul.mubr.f32.gmra.mrb[20].mxu1 %v1071_v57  ;;  %5101 = vmatmul.mubr.f32.gmra.mrb[22].mxu0 %v1089_v39  ;;  %v299_v48 = vpop.permute.xlu0 %298  ;;  %v1100_v13 = vsub.f32 %v6237_v14, %v1099_v51 }
  0xd4   : > { %vm434_vm14 = vcmp.eq.s32.totalorder %v302_v12, %v5980_v17  ;;  %vm433_vm15 = vcmp.eq.s32.totalorder %v299_v48, %v5980_v17  ;;  %4800 = vmatprep.mubr.f32.mxu1 %v1081_v23  ;;  %5103 = vmatprep.mubr.f32.mxu0 %v1099_v51  ;;  %v1110_v26 = vsub.f32 %v6235_v31, %v1109_v33 }
  0xd5   : > { %7340 = vst [vmem:[#allocation31_spill] sm:$0xff] %v6255_v18  ;;  %7341 = vst [vmem:[#allocation32_spill] sm:$0xff] %v6257_v63  ;;  %v6264_v52 = vsel %vm434_vm14, 1.0, %v7337_v27  ;;  %v6267_v1 = vsel %vm433_vm15, 1.0, %v7337_v27  ;;  %v1101_v57 = vand.u32 4294901760, %v1100_v13  ;;  %v1119_v39 = vand.u32 4294901760, %v6257_v63 }
  0xd6   : > { %v686_v14 = vsel %vm597_vm0, %v6264_v52, 0  ;;  %v683_v48 = vsel %vm597_vm0, %v6267_v1, 0  ;;  %v1129_v23 = vand.u32 4294901760, %v6255_v18  ;;  %v1111_v0 = vand.u32 4294901760, %v1110_v26 }
  0xd7   : > { %v6275_v58 = vsub.f32 %v686_v14, %v686_v14  ;;  %v6277_v51 = vsub.f32 %v683_v48, %v683_v48  ;;  %v308_v12 = vpop.permute.xlu1 %307  ;;  %4801 = vmatmul.mubr.f32.gmra.mrb[22].mxu1 %v1091_v22  ;;  %5104 = vmatmul.mubr.f32.gmra.mrb[24].mxu0 %v1109_v33  ;;  %v305_v31 = vpop.permute.xlu0 %304  ;;  %v1120_v13 = vsub.f32 %v6257_v63, %v1119_v39 }
  0xd8   : > { %vm436_vm1 = vcmp.eq.s32.totalorder %v308_v12, %v5980_v17  ;;  %vm435_vm2 = vcmp.eq.s32.totalorder %v305_v31, %v5980_v17  ;;  %4803 = vmatprep.mubr.f32.mxu1 %v1101_v57  ;;  %5106 = vmatprep.mubr.f32.mxu0 %v1119_v39  ;;  %v1130_v28 = vsub.f32 %v6255_v18, %v1129_v23 }
  0xd9   : > { %7342 = vst [vmem:[#allocation33_spill] sm:$0xff] %v6275_v58  ;;  %7343 = vst [vmem:[#allocation34_spill] sm:$0xff] %v6277_v51  ;;  %v6284_v14 = vsel %vm436_vm1, 1.0, %v7337_v27  ;;  %v6287_v48 = vsel %vm435_vm2, 1.0, %v7337_v27  ;;  %v1121_v22 = vand.u32 4294901760, %v1120_v13  ;;  %v1139_v33 = vand.u32 4294901760, %v6277_v51 }
  0xda   : > { %v692_v63 = vsel %vm597_vm0, %v6284_v14, 0  ;;  %v689_v31 = vsel %vm597_vm0, %v6287_v48, 0  ;;  %v1149_v57 = vand.u32 4294901760, %v6275_v58  ;;  %v1131_v44 = vand.u32 4294901760, %v1130_v28 }
  0xdb   : > { %v6295_v26 = vsub.f32 %v692_v63, %v692_v63  ;;  %v6297_v39 = vsub.f32 %v689_v31, %v689_v31  ;;  %v314_v12 = vpop.permute.xlu1 %313  ;;  %4804 = vmatmul.mubr.f32.gmra.mrb[24].mxu1 %v1111_v0  ;;  %5107 = vmatmul.mubr.f32.gmra.mrb[26].mxu0 %v1129_v23  ;;  %v311_v18 = vpop.permute.xlu0 %310  ;;  %v1140_v13 = vsub.f32 %v6277_v51, %v1139_v33 }
  0xdc   : > { %vm438_vm3 = vcmp.eq.s32.totalorder %v314_v12, %v5980_v17  ;;  %vm437_vm4 = vcmp.eq.s32.totalorder %v311_v18, %v5980_v17  ;;  %4806 = vmatprep.mubr.f32.mxu1 %v1121_v22  ;;  %5109 = vmatprep.mubr.f32.mxu0 %v1139_v33  ;;  %v1150_v47 = vsub.f32 %v6275_v58, %v1149_v57 }
  0xdd   : > { %7344 = vst [vmem:[#allocation35_spill] sm:$0xff] %v6295_v26  ;;  %7345 = vst [vmem:[#allocation36_spill] sm:$0xff] %v6297_v39  ;;  %v6304_v63 = vsel %vm438_vm3, 1.0, %v7337_v27  ;;  %v6307_v31 = vsel %vm437_vm4, 1.0, %v7337_v27  ;;  %v1141_v0 = vand.u32 4294901760, %v1140_v13  ;;  %v1159_v23 = vand.u32 4294901760, %v6297_v39 }
  0xde   : > { %v698_v51 = vsel %vm597_vm0, %v6304_v63, 0  ;;  %v695_v18 = vsel %vm597_vm0, %v6307_v31, 0  ;;  %v1169_v22 = vand.u32 4294901760, %v6295_v26  ;;  %v1151_v15 = vand.u32 4294901760, %v1150_v47 }
  0xdf   : > { %v6315_v28 = vsub.f32 %v698_v51, %v698_v51  ;;  %v6317_v33 = vsub.f32 %v695_v18, %v695_v18  ;;  %v320_v12 = vpop.permute.xlu1 %319  ;;  %4807 = vmatmul.mubr.f32.gmra.mrb[26].mxu1 %v1131_v44  ;;  %5110 = vmatmul.mubr.f32.gmra.mrb[28].mxu0 %v1149_v57  ;;  %v317_v58 = vpop.permute.xlu0 %316  ;;  %v1160_v13 = vsub.f32 %v6297_v39, %v1159_v23 }
  0xe0   : > { %vm440_vm5 = vcmp.eq.s32.totalorder %v320_v12, %v5980_v17  ;;  %vm439_vm6 = vcmp.eq.s32.totalorder %v317_v58, %v5980_v17  ;;  %4809 = vmatprep.mubr.f32.mxu1 %v1141_v0  ;;  %5112 = vmatprep.mubr.f32.mxu0 %v1159_v23  ;;  %v1170_v16 = vsub.f32 %v6295_v26, %v1169_v22 }
  0xe1   : > { %7346 = vst [vmem:[#allocation37_spill] sm:$0xff] %v6315_v28  ;;  %7347 = vst [vmem:[#allocation38_spill] sm:$0xff] %v6317_v33  ;;  %v6324_v51 = vsel %vm440_vm5, 1.0, %v7337_v27  ;;  %v6327_v18 = vsel %vm439_vm6, 1.0, %v7337_v27  ;;  %v1161_v44 = vand.u32 4294901760, %v1160_v13  ;;  %v1179_v57 = vand.u32 4294901760, %v6317_v33 }
  0xe2   : > { %v704_v39 = vsel %vm597_vm0, %v6324_v51, 0  ;;  %v701_v58 = vsel %vm597_vm0, %v6327_v18, 0  ;;  %v1189_v0 = vand.u32 4294901760, %v6315_v28  ;;  %v1171_v2 = vand.u32 4294901760, %v1170_v16 }
  0xe3   : > { %v6335_v47 = vsub.f32 %v704_v39, %v704_v39  ;;  %v6337_v23 = vsub.f32 %v701_v58, %v701_v58  ;;  %v326_v12 = vpop.permute.xlu1 %325  ;;  %4810 = vmatmul.mubr.f32.gmra.mrb[28].mxu1 %v1151_v15  ;;  %5113 = vmatmul.mubr.f32.gmra.mrb[30].mxu0 %v1169_v22  ;;  %v323_v26 = vpop.permute.xlu0 %322  ;;  %v1180_v13 = vsub.f32 %v6317_v33, %v1179_v57 }
  0xe4   : > { %vm442_vm7 = vcmp.eq.s32.totalorder %v326_v12, %v5980_v17  ;;  %vm441_vm8 = vcmp.eq.s32.totalorder %v323_v26, %v5980_v17  ;;  %4812 = vmatprep.mubr.f32.mxu1 %v1161_v44  ;;  %5115 = vmatprep.mubr.f32.mxu0 %v1179_v57  ;;  %v1190_v3 = vsub.f32 %v6315_v28, %v1189_v0 }
  0xe5   : > { %7348 = vst [vmem:[#allocation39_spill] sm:$0xff] %v6335_v47  ;;  %7349 = vst [vmem:[#allocation40_spill] sm:$0xff] %v6337_v23  ;;  %v6344_v39 = vsel %vm442_vm7, 1.0, %v7337_v27  ;;  %v6347_v58 = vsel %vm441_vm8, 1.0, %v7337_v27  ;;  %v1181_v15 = vand.u32 4294901760, %v1180_v13  ;;  %v1199_v22 = vand.u32 4294901760, %v6337_v23 }
  0xe6   : > { %v710_v33 = vsel %vm597_vm0, %v6344_v39, 0  ;;  %v707_v26 = vsel %vm597_vm0, %v6347_v58, 0  ;;  %v1209_v44 = vand.u32 4294901760, %v6335_v47  ;;  %v1191_v53 = vand.u32 4294901760, %v1190_v3 }
  0xe7   : > { %v6355_v16 = vsub.f32 %v710_v33, %v710_v33  ;;  %v6357_v57 = vsub.f32 %v707_v26, %v707_v26  ;;  %v332_v12 = vpop.permute.xlu1 %331  ;;  %4813 = vmatmul.mubr.f32.gmra.mrb[30].mxu1 %v1171_v2  ;;  %5116 = vmatmul.mubr.f32.gmra.mrb[32].mxu0 %v1189_v0  ;;  %v329_v28 = vpop.permute.xlu0 %328  ;;  %v1200_v13 = vsub.f32 %v6337_v23, %v1199_v22 }
  0xe8   : > { %vm444_vm9 = vcmp.eq.s32.totalorder %v332_v12, %v5980_v17  ;;  %vm443_vm10 = vcmp.eq.s32.totalorder %v329_v28, %v5980_v17  ;;  %4815 = vmatprep.mubr.f32.mxu1 %v1181_v15  ;;  %5118 = vmatprep.mubr.f32.mxu0 %v1199_v22  ;;  %v1210_v54 = vsub.f32 %v6335_v47, %v1209_v44 }
  0xe9   : > { %7350 = vst [vmem:[#allocation41_spill] sm:$0xff] %v6355_v16  ;;  %7351 = vst [vmem:[#allocation42_spill] sm:$0xff] %v6357_v57  ;;  %v6364_v33 = vsel %vm444_vm9, 1.0, %v7337_v27  ;;  %v6367_v26 = vsel %vm443_vm10, 1.0, %v7337_v27  ;;  %v1201_v2 = vand.u32 4294901760, %v1200_v13  ;;  %v1219_v0 = vand.u32 4294901760, %v6357_v57 }
  0xea   : > { %v716_v23 = vsel %vm597_vm0, %v6364_v33, 0  ;;  %v713_v28 = vsel %vm597_vm0, %v6367_v26, 0  ;;  %v1229_v15 = vand.u32 4294901760, %v6355_v16  ;;  %v1211_v40 = vand.u32 4294901760, %v1210_v54 }
  0xeb   : > { %v6375_v3 = vsub.f32 %v716_v23, %v716_v23  ;;  %v6377_v22 = vsub.f32 %v713_v28, %v713_v28  ;;  %v338_v12 = vpop.permute.xlu1 %337  ;;  %4816 = vmatmul.mubr.f32.gmra.mrb[32].mxu1 %v1191_v53  ;;  %5119 = vmatmul.mubr.f32.gmra.mrb[34].mxu0 %v1209_v44  ;;  %v335_v47 = vpop.permute.xlu0 %334  ;;  %v1220_v13 = vsub.f32 %v6357_v57, %v1219_v0 }
  0xec   : > { %vm446_vm11 = vcmp.eq.s32.totalorder %v338_v12, %v5980_v17  ;;  %vm445_vm12 = vcmp.eq.s32.totalorder %v335_v47, %v5980_v17  ;;  %4818 = vmatprep.mubr.f32.mxu1 %v1201_v2  ;;  %5121 = vmatprep.mubr.f32.mxu0 %v1219_v0  ;;  %v1230_v29 = vsub.f32 %v6355_v16, %v1229_v15 }
  0xed   : > { %7352 = vst [vmem:[#allocation43_spill] sm:$0xff] %v6375_v3  ;;  %7353 = vst [vmem:[#allocation44_spill] sm:$0xff] %v6377_v22  ;;  %v6384_v23 = vsel %vm446_vm11, 1.0, %v7337_v27  ;;  %v6387_v28 = vsel %vm445_vm12, 1.0, %v7337_v27  ;;  %v1221_v53 = vand.u32 4294901760, %v1220_v13  ;;  %v1239_v44 = vand.u32 4294901760, %v6377_v22 }
  0xee   : > { %v722_v57 = vsel %vm597_vm0, %v6384_v23, 0  ;;  %v719_v47 = vsel %vm597_vm0, %v6387_v28, 0  ;;  %v1249_v2 = vand.u32 4294901760, %v6375_v3  ;;  %v1231_v41 = vand.u32 4294901760, %v1230_v29 }
  0xef   : > { %v6395_v54 = vsub.f32 %v722_v57, %v722_v57  ;;  %v6397_v0 = vsub.f32 %v719_v47, %v719_v47  ;;  %v344_v12 = vpop.permute.xlu1 %343  ;;  %4819 = vmatmul.mubr.f32.gmra.mrb[34].mxu1 %v1211_v40  ;;  %5122 = vmatmul.mubr.f32.gmra.mrb[36].mxu0 %v1229_v15  ;;  %v341_v16 = vpop.permute.xlu0 %340  ;;  %v1240_v13 = vsub.f32 %v6377_v22, %v1239_v44 }
  0xf0   : > { %vm448_vm13 = vcmp.eq.s32.totalorder %v344_v12, %v5980_v17  ;;  %vm447_vm14 = vcmp.eq.s32.totalorder %v341_v16, %v5980_v17  ;;  %4821 = vmatprep.mubr.f32.mxu1 %v1221_v53  ;;  %5124 = vmatprep.mubr.f32.mxu0 %v1239_v44  ;;  %v1250_v30 = vsub.f32 %v6375_v3, %v1249_v2 }
  0xf1   : > { %7354 = vst [vmem:[#allocation45_spill] sm:$0xff] %v6395_v54  ;;  %7355 = vst [vmem:[#allocation46_spill] sm:$0xff] %v6397_v0  ;;  %v6404_v57 = vsel %vm448_vm13, 1.0, %v7337_v27  ;;  %v6407_v47 = vsel %vm447_vm14, 1.0, %v7337_v27  ;;  %v1241_v40 = vand.u32 4294901760, %v1240_v13  ;;  %v1259_v15 = vand.u32 4294901760, %v6397_v0 }
  0xf2   : > { %7356 = vst [vmem:[#allocation47_spill] sm:$0xff] %v6404_v57  ;;  %7357 = vst [vmem:[#allocation48_spill] sm:$0xff] %v6407_v47  ;;  %v728_v22 = vsel %vm597_vm0, %v6404_v57, 0  ;;  %v725_v16 = vsel %vm597_vm0, %v6407_v47, 0  ;;  %v1269_v53 = vand.u32 4294901760, %v6395_v54  ;;  %v1251_v57 = vand.u32 4294901760, %v1250_v30 }
  0xf3   : > { %v6415_v29 = vsub.f32 %v728_v22, %v728_v22  ;;  %v6417_v44 = vsub.f32 %v725_v16, %v725_v16  ;;  %v350_v12 = vpop.permute.xlu1 %349  ;;  %4822 = vmatmul.mubr.f32.gmra.mrb[36].mxu1 %v1231_v41  ;;  %5125 = vmatmul.mubr.f32.gmra.mrb[38].mxu0 %v1249_v2  ;;  %v347_v3 = vpop.permute.xlu0 %346  ;;  %v1260_v13 = vsub.f32 %v6397_v0, %v1259_v15 }
  0xf4   : > { %vm450_vm15 = vcmp.eq.s32.totalorder %v350_v12, %v5980_v17  ;;  %vm449_vm1 = vcmp.eq.s32.totalorder %v347_v3, %v5980_v17  ;;  %4824 = vmatprep.mubr.f32.mxu1 %v1241_v40  ;;  %5127 = vmatprep.mubr.f32.mxu0 %v1259_v15  ;;  %v1270_v47 = vsub.f32 %v6395_v54, %v1269_v53 }
  0xf5   : > { %7358 = vst [vmem:[#allocation49_spill] sm:$0xff] %v6415_v29  ;;  %7359 = vst [vmem:[#allocation50_spill] sm:$0xff] %v6417_v44  ;;  %v6424_v22 = vsel %vm450_vm15, 1.0, %v7337_v27  ;;  %v6427_v16 = vsel %vm449_vm1, 1.0, %v7337_v27  ;;  %v1261_v41 = vand.u32 4294901760, %v1260_v13  ;;  %v1279_v2 = vand.u32 4294901760, %v6417_v44 }
  0xf6   : > { %7360 = vst [vmem:[#allocation51_spill] sm:$0xff] %v6424_v22  ;;  %7361 = vst [vmem:[#allocation52_spill] sm:$0xff] %v6427_v16  ;;  %v734_v0 = vsel %vm597_vm0, %v6424_v22, 0  ;;  %v731_v3 = vsel %vm597_vm0, %v6427_v16, 0  ;;  %v1289_v40 = vand.u32 4294901760, %v6415_v29  ;;  %v1271_v22 = vand.u32 4294901760, %v1270_v47 }
  0xf7   : > { %v6435_v30 = vsub.f32 %v734_v0, %v734_v0  ;;  %v6437_v15 = vsub.f32 %v731_v3, %v731_v3  ;;  %v356_v12 = vpop.permute.xlu1 %355  ;;  %4825 = vmatmul.mubr.f32.gmra.mrb[38].mxu1 %v1251_v57  ;;  %5128 = vmatmul.mubr.f32.gmra.mrb[40].mxu0 %v1269_v53  ;;  %v353_v54 = vpop.permute.xlu0 %352  ;;  %v1280_v13 = vsub.f32 %v6417_v44, %v1279_v2 }
  0xf8   : > { %vm452_vm2 = vcmp.eq.s32.totalorder %v356_v12, %v5980_v17  ;;  %vm451_vm3 = vcmp.eq.s32.totalorder %v353_v54, %v5980_v17  ;;  %4827 = vmatprep.mubr.f32.mxu1 %v1261_v41  ;;  %5130 = vmatprep.mubr.f32.mxu0 %v1279_v2  ;;  %v1290_v16 = vsub.f32 %v6415_v29, %v1289_v40 }
  0xf9   : > { %7362 = vst [vmem:[#allocation53_spill] sm:$0xff] %v6435_v30  ;;  %7363 = vst [vmem:[#allocation54_spill] sm:$0xff] %v6437_v15  ;;  %v6444_v0 = vsel %vm452_vm2, 1.0, %v7337_v27  ;;  %v6447_v3 = vsel %vm451_vm3, 1.0, %v7337_v27  ;;  %v1281_v57 = vand.u32 4294901760, %v1280_v13  ;;  %v1299_v53 = vand.u32 4294901760, %v6437_v15 }
  0xfa   : > { %7364 = vst [vmem:[#allocation55_spill] sm:$0xff] %v6444_v0  ;;  %7365 = vst [vmem:[#allocation56_spill] sm:$0xff] %v6447_v3  ;;  %v740_v44 = vsel %vm597_vm0, %v6444_v0, 0  ;;  %v737_v54 = vsel %vm597_vm0, %v6447_v3, 0  ;;  %v1309_v41 = vand.u32 4294901760, %v6435_v30  ;;  %v1291_v0 = vand.u32 4294901760, %v1290_v16 }
  0xfb   : > { %v6455_v47 = vsub.f32 %v740_v44, %v740_v44  ;;  %v6457_v2 = vsub.f32 %v737_v54, %v737_v54  ;;  %v362_v12 = vpop.permute.xlu1 %361  ;;  %4828 = vmatmul.mubr.f32.gmra.mrb[40].mxu1 %v1271_v22  ;;  %5131 = vmatmul.mubr.f32.gmra.mrb[42].mxu0 %v1289_v40  ;;  %v359_v29 = vpop.permute.xlu0 %358  ;;  %v1300_v13 = vsub.f32 %v6437_v15, %v1299_v53 }
  0xfc   : > { %vm454_vm4 = vcmp.eq.s32.totalorder %v362_v12, %v5980_v17  ;;  %vm453_vm5 = vcmp.eq.s32.totalorder %v359_v29, %v5980_v17  ;;  %4830 = vmatprep.mubr.f32.mxu1 %v1281_v57  ;;  %5133 = vmatprep.mubr.f32.mxu0 %v1299_v53  ;;  %v1310_v3 = vsub.f32 %v6435_v30, %v1309_v41 }
  0xfd   : > { %7366 = vst [vmem:[#allocation57_spill] sm:$0xff] %v6455_v47  ;;  %7367 = vst [vmem:[#allocation58_spill] sm:$0xff] %v6457_v2  ;;  %v6464_v44 = vsel %vm454_vm4, 1.0, %v7337_v27  ;;  %v6467_v54 = vsel %vm453_vm5, 1.0, %v7337_v27  ;;  %v1301_v22 = vand.u32 4294901760, %v1300_v13  ;;  %v1319_v40 = vand.u32 4294901760, %v6457_v2 }
  0xfe   : > { %7368 = vst [vmem:[#allocation59_spill] sm:$0xff] %v6464_v44  ;;  %7369 = vst [vmem:[#allocation60_spill] sm:$0xff] %v6467_v54  ;;  %v746_v15 = vsel %vm597_vm0, %v6464_v44, 0  ;;  %v743_v29 = vsel %vm597_vm0, %v6467_v54, 0  ;;  %v1329_v57 = vand.u32 4294901760, %v6455_v47  ;;  %v1311_v44 = vand.u32 4294901760, %v1310_v3 }
  0xff   : > { %v6475_v16 = vsub.f32 %v746_v15, %v746_v15  ;;  %v6477_v53 = vsub.f32 %v743_v29, %v743_v29  ;;  %v368_v12 = vpop.permute.xlu1 %367  ;;  %4831 = vmatmul.mubr.f32.gmra.mrb[42].mxu1 %v1291_v0  ;;  %5134 = vmatmul.mubr.f32.gmra.mrb[44].mxu0 %v1309_v41  ;;  %v365_v30 = vpop.permute.xlu0 %364  ;;  %v1320_v13 = vsub.f32 %v6457_v2, %v1319_v40 }
 0x100   : > { %vm456_vm6 = vcmp.eq.s32.totalorder %v368_v12, %v5980_v17  ;;  %vm455_vm7 = vcmp.eq.s32.totalorder %v365_v30, %v5980_v17  ;;  %4833 = vmatprep.mubr.f32.mxu1 %v1301_v22  ;;  %5136 = vmatprep.mubr.f32.mxu0 %v1319_v40  ;;  %v1330_v54 = vsub.f32 %v6455_v47, %v1329_v57 }
 0x101   : > { %7370 = vst [vmem:[#allocation61_spill] sm:$0xff] %v6475_v16  ;;  %7371 = vst [vmem:[#allocation62_spill] sm:$0xff] %v6477_v53  ;;  %v6484_v15 = vsel %vm456_vm6, 1.0, %v7337_v27  ;;  %v6487_v29 = vsel %vm455_vm7, 1.0, %v7337_v27  ;;  %v1321_v0 = vand.u32 4294901760, %v1320_v13  ;;  %v1339_v41 = vand.u32 4294901760, %v6477_v53 }
 0x102   : > { %7372 = vst [vmem:[#allocation63_spill] sm:$0xff] %v6484_v15  ;;  %7373 = vst [vmem:[#allocation64_spill] sm:$0xff] %v6487_v29  ;;  %v752_v2 = vsel %vm597_vm0, %v6484_v15, 0  ;;  %v749_v30 = vsel %vm597_vm0, %v6487_v29, 0  ;;  %v1349_v22 = vand.u32 4294901760, %v6475_v16  ;;  %v1331_v15 = vand.u32 4294901760, %v1330_v54 }
 0x103   : > { %v6495_v3 = vsub.f32 %v752_v2, %v752_v2  ;;  %v6497_v40 = vsub.f32 %v749_v30, %v749_v30  ;;  %v374_v12 = vpop.permute.xlu1 %373  ;;  %4834 = vmatmul.mubr.f32.gmra.mrb[44].mxu1 %v1311_v44  ;;  %5137 = vmatmul.mubr.f32.gmra.mrb[46].mxu0 %v1329_v57  ;;  %v371_v47 = vpop.permute.xlu0 %370  ;;  %v1340_v13 = vsub.f32 %v6477_v53, %v1339_v41 }
 0x104   : > { %vm458_vm8 = vcmp.eq.s32.totalorder %v374_v12, %v5980_v17  ;;  %vm457_vm9 = vcmp.eq.s32.totalorder %v371_v47, %v5980_v17  ;;  %4836 = vmatprep.mubr.f32.mxu1 %v1321_v0  ;;  %5139 = vmatprep.mubr.f32.mxu0 %v1339_v41  ;;  %v1350_v29 = vsub.f32 %v6475_v16, %v1349_v22 }
 0x105   : > { %7374 = vst [vmem:[#allocation65_spill] sm:$0xff] %v6495_v3  ;;  %7375 = vst [vmem:[#allocation66_spill] sm:$0xff] %v6497_v40  ;;  %v6504_v2 = vsel %vm458_vm8, 1.0, %v7337_v27  ;;  %v6507_v30 = vsel %vm457_vm9, 1.0, %v7337_v27  ;;  %v1341_v44 = vand.u32 4294901760, %v1340_v13  ;;  %v1359_v57 = vand.u32 4294901760, %v6497_v40 }
 0x106   : > { %7376 = vst [vmem:[#allocation67_spill] sm:$0xff] %v6504_v2  ;;  %7377 = vst [vmem:[#allocation68_spill] sm:$0xff] %v6507_v30  ;;  %v758_v53 = vsel %vm597_vm0, %v6504_v2, 0  ;;  %v755_v47 = vsel %vm597_vm0, %v6507_v30, 0  ;;  %v1369_v0 = vand.u32 4294901760, %v6495_v3  ;;  %v1351_v2 = vand.u32 4294901760, %v1350_v29 }
 0x107   : > { %v6515_v54 = vsub.f32 %v758_v53, %v758_v53  ;;  %v6517_v41 = vsub.f32 %v755_v47, %v755_v47  ;;  %v380_v12 = vpop.permute.xlu1 %379  ;;  %4837 = vmatmul.mubr.f32.gmra.mrb[46].mxu1 %v1331_v15  ;;  %5140 = vmatmul.mubr.f32.gmra.mrb[48].mxu0 %v1349_v22  ;;  %v377_v16 = vpop.permute.xlu0 %376  ;;  %v1360_v13 = vsub.f32 %v6497_v40, %v1359_v57 }
 0x108   : > { %vm460_vm10 = vcmp.eq.s32.totalorder %v380_v12, %v5980_v17  ;;  %vm459_vm11 = vcmp.eq.s32.totalorder %v377_v16, %v5980_v17  ;;  %4839 = vmatprep.mubr.f32.mxu1 %v1341_v44  ;;  %5142 = vmatprep.mubr.f32.mxu0 %v1359_v57  ;;  %v1370_v30 = vsub.f32 %v6495_v3, %v1369_v0 }
 0x109   : > { %7378 = vst [vmem:[#allocation69_spill] sm:$0xff] %v6515_v54  ;;  %7379 = vst [vmem:[#allocation70_spill] sm:$0xff] %v6517_v41  ;;  %v6524_v53 = vsel %vm460_vm10, 1.0, %v7337_v27  ;;  %v6527_v47 = vsel %vm459_vm11, 1.0, %v7337_v27  ;;  %v1361_v15 = vand.u32 4294901760, %v1360_v13  ;;  %v1379_v22 = vand.u32 4294901760, %v6517_v41 }
 0x10a   : > { %7380 = vst [vmem:[#allocation71_spill] sm:$0xff] %v6524_v53  ;;  %7381 = vst [vmem:[#allocation72_spill] sm:$0xff] %v6527_v47  ;;  %v764_v40 = vsel %vm597_vm0, %v6524_v53, 0  ;;  %v761_v16 = vsel %vm597_vm0, %v6527_v47, 0  ;;  %v1389_v44 = vand.u32 4294901760, %v6515_v54  ;;  %v1371_v53 = vand.u32 4294901760, %v1370_v30 }
 0x10b   : > { %v6535_v29 = vsub.f32 %v764_v40, %v764_v40  ;;  %v6537_v57 = vsub.f32 %v761_v16, %v761_v16  ;;  %v386_v12 = vpop.permute.xlu1 %385  ;;  %4840 = vmatmul.mubr.f32.gmra.mrb[48].mxu1 %v1351_v2  ;;  %5143 = vmatmul.mubr.f32.gmra.mrb[50].mxu0 %v1369_v0  ;;  %v383_v3 = vpop.permute.xlu0 %382  ;;  %v1380_v13 = vsub.f32 %v6517_v41, %v1379_v22 }
 0x10c   : > { %vm462_vm12 = vcmp.eq.s32.totalorder %v386_v12, %v5980_v17  ;;  %vm461_vm13 = vcmp.eq.s32.totalorder %v383_v3, %v5980_v17  ;;  %4842 = vmatprep.mubr.f32.mxu1 %v1361_v15  ;;  %5145 = vmatprep.mubr.f32.mxu0 %v1379_v22  ;;  %v1390_v47 = vsub.f32 %v6515_v54, %v1389_v44 }
 0x10d   : > { %7382 = vst [vmem:[#allocation73_spill] sm:$0xff] %v6535_v29  ;;  %7383 = vst [vmem:[#allocation74_spill] sm:$0xff] %v6537_v57  ;;  %v6544_v40 = vsel %vm462_vm12, 1.0, %v7337_v27  ;;  %v6547_v16 = vsel %vm461_vm13, 1.0, %v7337_v27  ;;  %v1381_v2 = vand.u32 4294901760, %v1380_v13  ;;  %v1399_v0 = vand.u32 4294901760, %v6537_v57 }
 0x10e   : > { %7384 = vst [vmem:[#allocation75_spill] sm:$0xff] %v6544_v40  ;;  %7385 = vst [vmem:[#allocation76_spill] sm:$0xff] %v6547_v16  ;;  %v770_v41 = vsel %vm597_vm0, %v6544_v40, 0  ;;  %v767_v3 = vsel %vm597_vm0, %v6547_v16, 0  ;;  %v1409_v15 = vand.u32 4294901760, %v6535_v29  ;;  %v1391_v40 = vand.u32 4294901760, %v1390_v47 }
 0x10f   : > { %v6555_v30 = vsub.f32 %v770_v41, %v770_v41  ;;  %v6557_v22 = vsub.f32 %v767_v3, %v767_v3  ;;  %v392_v12 = vpop.permute.xlu1 %391  ;;  %4843 = vmatmul.mubr.f32.gmra.mrb[50].mxu1 %v1371_v53  ;;  %5146 = vmatmul.mubr.f32.gmra.mrb[52].mxu0 %v1389_v44  ;;  %v389_v54 = vpop.permute.xlu0 %388  ;;  %v1400_v13 = vsub.f32 %v6537_v57, %v1399_v0 }
 0x110   : > { %vm464_vm14 = vcmp.eq.s32.totalorder %v392_v12, %v5980_v17  ;;  %vm463_vm15 = vcmp.eq.s32.totalorder %v389_v54, %v5980_v17  ;;  %4845 = vmatprep.mubr.f32.mxu1 %v1381_v2  ;;  %5148 = vmatprep.mubr.f32.mxu0 %v1399_v0  ;;  %v1410_v16 = vsub.f32 %v6535_v29, %v1409_v15 }
 0x111   : > { %7386 = vst [vmem:[#allocation77_spill] sm:$0xff] %v6555_v30  ;;  %7387 = vst [vmem:[#allocation78_spill] sm:$0xff] %v6557_v22  ;;  %v6564_v41 = vsel %vm464_vm14, 1.0, %v7337_v27  ;;  %v6567_v3 = vsel %vm463_vm15, 1.0, %v7337_v27  ;;  %v1401_v53 = vand.u32 4294901760, %v1400_v13  ;;  %v1419_v44 = vand.u32 4294901760, %v6557_v22 }
 0x112   : > { %7388 = vst [vmem:[#allocation79_spill] sm:$0xff] %v6564_v41  ;;  %7389 = vst [vmem:[#allocation80_spill] sm:$0xff] %v6567_v3  ;;  %v776_v57 = vsel %vm597_vm0, %v6564_v41, 0  ;;  %v773_v54 = vsel %vm597_vm0, %v6567_v3, 0  ;;  %v1429_v2 = vand.u32 4294901760, %v6555_v30  ;;  %v1411_v41 = vand.u32 4294901760, %v1410_v16 }
 0x113   : > { %v6575_v47 = vsub.f32 %v776_v57, %v776_v57  ;;  %v6577_v0 = vsub.f32 %v773_v54, %v773_v54  ;;  %v398_v12 = vpop.permute.xlu1 %397  ;;  %4846 = vmatmul.mubr.f32.gmra.mrb[52].mxu1 %v1391_v40  ;;  %5149 = vmatmul.mubr.f32.gmra.mrb[54].mxu0 %v1409_v15  ;;  %v395_v29 = vpop.permute.xlu0 %394  ;;  %v1420_v13 = vsub.f32 %v6557_v22, %v1419_v44 }
 0x114   : > { %vm466_vm1 = vcmp.eq.s32.totalorder %v398_v12, %v5980_v17  ;;  %vm465_vm2 = vcmp.eq.s32.totalorder %v395_v29, %v5980_v17  ;;  %4848 = vmatprep.mubr.f32.mxu1 %v1401_v53  ;;  %5151 = vmatprep.mubr.f32.mxu0 %v1419_v44  ;;  %v1430_v3 = vsub.f32 %v6555_v30, %v1429_v2 }
 0x115   : > { %7390 = vst [vmem:[#allocation81_spill] sm:$0xff] %v6575_v47  ;;  %7391 = vst [vmem:[#allocation82_spill] sm:$0xff] %v6577_v0  ;;  %v6584_v57 = vsel %vm466_vm1, 1.0, %v7337_v27  ;;  %v6587_v54 = vsel %vm465_vm2, 1.0, %v7337_v27  ;;  %v1421_v40 = vand.u32 4294901760, %v1420_v13  ;;  %v1439_v15 = vand.u32 4294901760, %v6577_v0 }
 0x116   : > { %7392 = vst [vmem:[#allocation83_spill] sm:$0xff] %v6584_v57  ;;  %7393 = vst [vmem:[#allocation84_spill] sm:$0xff] %v6587_v54  ;;  %v782_v22 = vsel %vm597_vm0, %v6584_v57, 0  ;;  %v779_v29 = vsel %vm597_vm0, %v6587_v54, 0  ;;  %v1449_v53 = vand.u32 4294901760, %v6575_v47  ;;  %v1431_v57 = vand.u32 4294901760, %v1430_v3 }
 0x117   : > { %v6595_v16 = vsub.f32 %v782_v22, %v782_v22  ;;  %v6597_v44 = vsub.f32 %v779_v29, %v779_v29  ;;  %v404_v12 = vpop.permute.xlu1 %403  ;;  %4849 = vmatmul.mubr.f32.gmra.mrb[54].mxu1 %v1411_v41  ;;  %5152 = vmatmul.mubr.f32.gmra.mrb[56].mxu0 %v1429_v2  ;;  %v401_v30 = vpop.permute.xlu0 %400  ;;  %v1440_v13 = vsub.f32 %v6577_v0, %v1439_v15 }
 0x118   : > { %vm468_vm3 = vcmp.eq.s32.totalorder %v404_v12, %v5980_v17  ;;  %vm467_vm4 = vcmp.eq.s32.totalorder %v401_v30, %v5980_v17  ;;  %4851 = vmatprep.mubr.f32.mxu1 %v1421_v40  ;;  %5154 = vmatprep.mubr.f32.mxu0 %v1439_v15  ;;  %v1450_v54 = vsub.f32 %v6575_v47, %v1449_v53 }
 0x119   : > { %7394 = vst [vmem:[#allocation85_spill] sm:$0xff] %v6595_v16  ;;  %7395 = vst [vmem:[#allocation86_spill] sm:$0xff] %v6597_v44  ;;  %v6604_v22 = vsel %vm468_vm3, 1.0, %v7337_v27  ;;  %v6607_v29 = vsel %vm467_vm4, 1.0, %v7337_v27  ;;  %v1441_v41 = vand.u32 4294901760, %v1440_v13  ;;  %v1459_v2 = vand.u32 4294901760, %v6597_v44 }
 0x11a   : > { %7396 = vst [vmem:[#allocation87_spill] sm:$0xff] %v6604_v22  ;;  %7397 = vst [vmem:[#allocation88_spill] sm:$0xff] %v6607_v29  ;;  %v788_v0 = vsel %vm597_vm0, %v6604_v22, 0  ;;  %v785_v17 = vsel %vm597_vm0, %v6607_v29, 0  ;;  %v1469_v30 = vand.u32 4294901760, %v6595_v16  ;;  %v1451_v15 = vand.u32 4294901760, %v1450_v54 }
 0x11b   : > { %v6615_v3 = vsub.f32 %v788_v0, %v788_v0  ;;  %v6617_v40 = vsub.f32 %v785_v17, %v785_v17  ;;  %4852 = vmatmul.mubr.f32.gmra.mrb[56].mxu1 %v1431_v57  ;;  %5155 = vmatmul.mubr.f32.gmra.mrb[58].mxu0 %v1449_v53  ;;  %v1460_v27 = vsub.f32 %v6597_v44, %v1459_v2  ;;  %v7405_v17 = vld [vmem:[#allocation55_spill] sm:$0xff] }
 0x11c   : > { %4854 = vmatprep.mubr.f32.mxu1 %v1441_v41  ;;  %5157 = vmatprep.mubr.f32.mxu0 %v1459_v2  ;;  %v5371_v12 = vpack.c.bf16 %v5914_v21, %v5912_v20  ;;  %v1470_v22 = vsub.f32 %v6595_v16, %v1469_v30  ;;  %v7401_v21 = vld [vmem:[#allocation47_spill] sm:$0xff]  ;;  %v7404_v2 = vld [vmem:[#allocation56_spill] sm:$0xff] }
 0x11d   : > { %7398 = vst [vmem:[#allocation89_spill] sm:$0xff] %v6615_v3  ;;  %7399 = vst [vmem:[#allocation90_spill] sm:$0xff] %v6617_v40  ;;  %v1461_v13 = vand.u32 4294901760, %v1460_v27  ;;  %v1479_v47 = vand.u32 4294901760, %v6617_v40  ;;  %v1489_v0 = vand.u32 4294901760, %v6615_v3  ;;  %v7407_v27 = vld [vmem:[#allocation59_spill] sm:$0xff] }
 0x11e   : > { %5372 = vmatprep.subr.bf16.mxu1 %v5371_v12  ;;  %v1471_v53 = vand.u32 4294901760, %v1470_v22  ;;  %v7403_v22 = vld [vmem:[#allocation51_spill] sm:$0xff] }
 0x11f   : > { %4855 = vmatmul.mubr.f32.gmra.mrb[58].mxu1 %v1451_v15  ;;  %5158 = vmatmul.mubr.f32.gmra.mrb[60].mxu0 %v1469_v30  ;;  %v1480_v57 = vsub.f32 %v6617_v40, %v1479_v47  ;;  %v1490_v54 = vsub.f32 %v6615_v3, %v1489_v0  ;;  %v7406_v30 = vld [vmem:[#allocation60_spill] sm:$0xff]  ;;  %v7417_v3 = vld [vmem:[#allocation79_spill] sm:$0xff] }
 0x120   : > { %4857 = vmatprep.mubr.f32.mxu1 %v1461_v13  ;;  %5160 = vmatprep.mubr.f32.mxu0 %v1479_v47  ;;  %v7402_v47 = vld [vmem:[#allocation52_spill] sm:$0xff]  ;;  %v7419_v16 = vld [vmem:[#allocation83_spill] sm:$0xff] }
 0x121   : > { %v1481_v41 = vand.u32 4294901760, %v1480_v57  ;;  %v1491_v20 = vand.u32 4294901760, %v1490_v54  ;;  %v7408_v15 = vld [vmem:[#allocation64_spill] sm:$0xff]  ;;  %v7415_v54 = vld [vmem:[#allocation75_spill] sm:$0xff] }
 0x122   : > { %v7410_v13 = vld [vmem:[#allocation68_spill] sm:$0xff]  ;;  %v7420_v44 = vld [vmem:[#allocation87_spill] sm:$0xff] }
 0x123   : > { %4858 = vmatmul.mubr.f32.gmra.mrb[60].mxu1 %v1471_v53  ;;  %5161 = vmatmul.mubr.f32.gmra.mrb[62].mxu0 %v1489_v0  ;;  %v7411_v0 = vld [vmem:[#allocation67_spill] sm:$0xff]  ;;  %v7412_v57 = vld [vmem:[#allocation72_spill] sm:$0xff] }
 0x124   : > { %4860 = vmatprep.mubr.f32.mxu1 %v1481_v41  ;;  %5167 = vmatprep.mubr.msk.f32.mxu0 %vm597_vm0, %v5988_v25  ;;  %v7413_v53 = vld [vmem:[#allocation71_spill] sm:$0xff]  ;;  %v7414_v41 = vld [vmem:[#allocation76_spill] sm:$0xff] }
 0x125   : > { %v7418_v40 = vld [vmem:[#allocation84_spill] sm:$0xff] }
 0x127   : > { %4861 = vmatmul.mubr.f32.gmra.mrb[62].mxu1 %v1491_v20  ;;  %5168 = vmatmul.mubr.msk.f32.vlgmr.msra.gmra.mrb[0].mxu0 %vm597_vm0, %v6004_v35  ;;  %v7416_v20 = vld [vmem:[#allocation80_spill] sm:$0xff] }
 0x128   : > { %4867 = vmatprep.mubr.msk.f32.mxu1 %vm597_vm0, %v5988_v25  ;;  %5170 = vmatprep.mubr.msk.f32.mxu0 %vm597_vm0, %v5985_v24 }
 0x129   : > { %5386 = vmatpush3.bf16.msra.mxu0 %v5910_v19  ;;  %v7400_v19 = vld [vmem:[#allocation48_spill] sm:$0xff] }
 0x12b   : > { %4868 = vmatmul.mubr.msk.f32.vlgmr.msra.gmra.mrb[0].mxu1 %vm597_vm0, %v6004_v35  ;;  %5171 = vmatmul.mubr.msk.f32.gmra.mrb[2].mxu0 %vm597_vm0, %v6001_v34 }
 0x12c   : > { %5374 = vmatpush3.bf16.msra.mxu1 %v5371_v12  ;;  %4870 = vmatprep.mubr.msk.f32.mxu1 %vm597_vm0, %v5985_v24  ;;  %v7409_v12 = vld [vmem:[#allocation63_spill] sm:$0xff] }
 0x12d   : > { %5173 = vmatprep.mubr.msk.f32.mxu0 %vm597_vm0, %v6023_v46 }
 0x12f   : > { %4871 = vmatmul.mubr.msk.f32.gmra.mrb[2].mxu1 %vm597_vm0, %v6001_v34  ;;  %5174 = vmatmul.mubr.msk.f32.gmra.mrb[4].mxu0 %vm597_vm0, %v6020_v45 }
 0x130   : > { %4873 = vmatprep.mubr.msk.f32.mxu1 %vm597_vm0, %v6023_v46  ;;  %5176 = vmatprep.mubr.msk.f32.mxu0 %vm597_vm0, %v6045_v60 }
 0x133   : > { %4874 = vmatmul.mubr.msk.f32.gmra.mrb[4].mxu1 %vm597_vm0, %v6020_v45  ;;  %5177 = vmatmul.mubr.msk.f32.gmra.mrb[6].mxu0 %vm597_vm0, %v6042_v59 }
 0x134   : > { %4876 = vmatprep.mubr.msk.f32.mxu1 %vm597_vm0, %v6045_v60  ;;  %5179 = vmatprep.mubr.msk.f32.mxu0 %vm597_vm0, %v6067_v10 }
 0x137   : > { %4877 = vmatmul.mubr.msk.f32.gmra.mrb[6].mxu1 %vm597_vm0, %v6042_v59  ;;  %5180 = vmatmul.mubr.msk.f32.gmra.mrb[8].mxu0 %vm597_vm0, %v6064_v9 }
 0x138   : > { %4879 = vmatprep.mubr.msk.f32.mxu1 %vm597_vm0, %v6067_v10  ;;  %5182 = vmatprep.mubr.msk.f32.mxu0 %vm597_vm0, %v6087_v36 }
 0x13b   : > { %4880 = vmatmul.mubr.msk.f32.gmra.mrb[8].mxu1 %vm597_vm0, %v6064_v9  ;;  %5183 = vmatmul.mubr.msk.f32.gmra.mrb[10].mxu0 %vm597_vm0, %v6084_v32 }
 0x13c   : > { %4882 = vmatprep.mubr.msk.f32.mxu1 %vm597_vm0, %v6087_v36  ;;  %5185 = vmatprep.mubr.msk.f32.mxu0 %vm597_vm0, %v6107_v56 }
 0x13f   : > { %4883 = vmatmul.mubr.msk.f32.gmra.mrb[10].mxu1 %vm597_vm0, %v6084_v32  ;;  %5186 = vmatmul.mubr.msk.f32.gmra.mrb[12].mxu0 %vm597_vm0, %v6104_v55 }
 0x140   : > { %4885 = vmatprep.mubr.msk.f32.mxu1 %vm597_vm0, %v6107_v56  ;;  %5188 = vmatprep.mubr.msk.f32.mxu0 %vm597_vm0, %v6127_v11 }
 0x143   : > { %4886 = vmatmul.mubr.msk.f32.gmra.mrb[12].mxu1 %vm597_vm0, %v6104_v55  ;;  %5189 = vmatmul.mubr.msk.f32.gmra.mrb[14].mxu0 %vm597_vm0, %v6124_v8 }
 0x144   : > { %4888 = vmatprep.mubr.msk.f32.mxu1 %vm597_vm0, %v6127_v11  ;;  %5191 = vmatprep.mubr.msk.f32.mxu0 %vm597_vm0, %v6147_v43 }
 0x147   : > { %4889 = vmatmul.mubr.msk.f32.gmra.mrb[14].mxu1 %vm597_vm0, %v6124_v8  ;;  %5192 = vmatmul.mubr.msk.f32.gmra.mrb[16].mxu0 %vm597_vm0, %v6144_v42 }
 0x148   : > { %4891 = vmatprep.mubr.msk.f32.mxu1 %vm597_vm0, %v6147_v43  ;;  %5194 = vmatprep.mubr.msk.f32.mxu0 %vm597_vm0, %v6167_v6 }
 0x14b   : > { %4892 = vmatmul.mubr.msk.f32.gmra.mrb[16].mxu1 %vm597_vm0, %v6144_v42  ;;  %5195 = vmatmul.mubr.msk.f32.gmra.mrb[18].mxu0 %vm597_vm0, %v6164_v5 }
 0x14c   : > { %4894 = vmatprep.mubr.msk.f32.mxu1 %vm597_vm0, %v6167_v6  ;;  %5197 = vmatprep.mubr.msk.f32.mxu0 %vm597_vm0, %v6187_v50 }
 0x14f   : > { %4895 = vmatmul.mubr.msk.f32.gmra.mrb[18].mxu1 %vm597_vm0, %v6164_v5  ;;  %5198 = vmatmul.mubr.msk.f32.gmra.mrb[20].mxu0 %vm597_vm0, %v6184_v49 }
 0x150   : > { %4897 = vmatprep.mubr.msk.f32.mxu1 %vm597_vm0, %v6187_v50  ;;  %5200 = vmatprep.mubr.msk.f32.mxu0 %vm597_vm0, %v6207_v38 }
 0x153   : > { %4898 = vmatmul.mubr.msk.f32.gmra.mrb[20].mxu1 %vm597_vm0, %v6184_v49  ;;  %5201 = vmatmul.mubr.msk.f32.gmra.mrb[22].mxu0 %vm597_vm0, %v6204_v37 }
 0x154   : > { %4900 = vmatprep.mubr.msk.f32.mxu1 %vm597_vm0, %v6207_v38  ;;  %5203 = vmatprep.mubr.msk.f32.mxu0 %vm597_vm0, %v6227_v62 }
 0x157   : > { %4901 = vmatmul.mubr.msk.f32.gmra.mrb[22].mxu1 %vm597_vm0, %v6204_v37  ;;  %5204 = vmatmul.mubr.msk.f32.gmra.mrb[24].mxu0 %vm597_vm0, %v6224_v61 }
 0x158   : > { %4903 = vmatprep.mubr.msk.f32.mxu1 %vm597_vm0, %v6227_v62  ;;  %5206 = vmatprep.mubr.msk.f32.mxu0 %vm597_vm0, %v6247_v7 }
 0x15b   : > { %4904 = vmatmul.mubr.msk.f32.gmra.mrb[24].mxu1 %vm597_vm0, %v6224_v61  ;;  %5207 = vmatmul.mubr.msk.f32.gmra.mrb[26].mxu0 %vm597_vm0, %v6244_v4 }
 0x15c   : > { %4906 = vmatprep.mubr.msk.f32.mxu1 %vm597_vm0, %v6247_v7  ;;  %5209 = vmatprep.mubr.msk.f32.mxu0 %vm597_vm0, %v6267_v1 }
 0x15f   : > { %4907 = vmatmul.mubr.msk.f32.gmra.mrb[26].mxu1 %vm597_vm0, %v6244_v4  ;;  %5210 = vmatmul.mubr.msk.f32.gmra.mrb[28].mxu0 %vm597_vm0, %v6264_v52 }
 0x160   : > { %4909 = vmatprep.mubr.msk.f32.mxu1 %vm597_vm0, %v6267_v1  ;;  %5212 = vmatprep.mubr.msk.f32.mxu0 %vm597_vm0, %v6287_v48 }
 0x163   : > { %4910 = vmatmul.mubr.msk.f32.gmra.mrb[28].mxu1 %vm597_vm0, %v6264_v52  ;;  %5213 = vmatmul.mubr.msk.f32.gmra.mrb[30].mxu0 %vm597_vm0, %v6284_v14 }
 0x164   : > { %4912 = vmatprep.mubr.msk.f32.mxu1 %vm597_vm0, %v6287_v48  ;;  %5215 = vmatprep.mubr.msk.f32.mxu0 %vm597_vm0, %v6307_v31 }
 0x167   : > { %4913 = vmatmul.mubr.msk.f32.gmra.mrb[30].mxu1 %vm597_vm0, %v6284_v14  ;;  %5216 = vmatmul.mubr.msk.f32.gmra.mrb[32].mxu0 %vm597_vm0, %v6304_v63 }
 0x168   : > { %4915 = vmatprep.mubr.msk.f32.mxu1 %vm597_vm0, %v6307_v31  ;;  %5218 = vmatprep.mubr.msk.f32.mxu0 %vm597_vm0, %v6327_v18 }
 0x16b   : > { %4916 = vmatmul.mubr.msk.f32.gmra.mrb[32].mxu1 %vm597_vm0, %v6304_v63  ;;  %5219 = vmatmul.mubr.msk.f32.gmra.mrb[34].mxu0 %vm597_vm0, %v6324_v51 }
 0x16c   : > { %4918 = vmatprep.mubr.msk.f32.mxu1 %vm597_vm0, %v6327_v18  ;;  %5221 = vmatprep.mubr.msk.f32.mxu0 %vm597_vm0, %v6347_v58 }
 0x16f   : > { %4919 = vmatmul.mubr.msk.f32.gmra.mrb[34].mxu1 %vm597_vm0, %v6324_v51  ;;  %5222 = vmatmul.mubr.msk.f32.gmra.mrb[36].mxu0 %vm597_vm0, %v6344_v39 }
 0x170   : > { %4921 = vmatprep.mubr.msk.f32.mxu1 %vm597_vm0, %v6347_v58  ;;  %5224 = vmatprep.mubr.msk.f32.mxu0 %vm597_vm0, %v6367_v26 }
 0x173   : > { %4922 = vmatmul.mubr.msk.f32.gmra.mrb[36].mxu1 %vm597_vm0, %v6344_v39  ;;  %5225 = vmatmul.mubr.msk.f32.gmra.mrb[38].mxu0 %vm597_vm0, %v6364_v33 }
 0x174   : > { %4924 = vmatprep.mubr.msk.f32.mxu1 %vm597_vm0, %v6367_v26  ;;  %5227 = vmatprep.mubr.msk.f32.mxu0 %vm597_vm0, %v6387_v28 }
 0x177   : > { %4925 = vmatmul.mubr.msk.f32.gmra.mrb[38].mxu1 %vm597_vm0, %v6364_v33  ;;  %5228 = vmatmul.mubr.msk.f32.gmra.mrb[40].mxu0 %vm597_vm0, %v6384_v23 }
 0x178   : > { %4927 = vmatprep.mubr.msk.f32.mxu1 %vm597_vm0, %v6387_v28  ;;  %5230 = vmatprep.mubr.msk.f32.mxu0 %vm597_vm0, %v7400_v19 }
 0x17b   : > { %4928 = vmatmul.mubr.msk.f32.gmra.mrb[40].mxu1 %vm597_vm0, %v6384_v23  ;;  %5231 = vmatmul.mubr.msk.f32.gmra.mrb[42].mxu0 %vm597_vm0, %v7401_v21 }
 0x17c   : > { %4930 = vmatprep.mubr.msk.f32.mxu1 %vm597_vm0, %v7400_v19  ;;  %5233 = vmatprep.mubr.msk.f32.mxu0 %vm597_vm0, %v7402_v47 }
 0x17f   : > { %4931 = vmatmul.mubr.msk.f32.gmra.mrb[42].mxu1 %vm597_vm0, %v7401_v21  ;;  %5234 = vmatmul.mubr.msk.f32.gmra.mrb[44].mxu0 %vm597_vm0, %v7403_v22 }
 0x180   : > { %4933 = vmatprep.mubr.msk.f32.mxu1 %vm597_vm0, %v7402_v47  ;;  %5236 = vmatprep.mubr.msk.f32.mxu0 %vm597_vm0, %v7404_v2 }
 0x183   : > { %4934 = vmatmul.mubr.msk.f32.gmra.mrb[44].mxu1 %vm597_vm0, %v7403_v22  ;;  %5237 = vmatmul.mubr.msk.f32.gmra.mrb[46].mxu0 %vm597_vm0, %v7405_v17 }
 0x184   : > { %4936 = vmatprep.mubr.msk.f32.mxu1 %vm597_vm0, %v7404_v2  ;;  %5239 = vmatprep.mubr.msk.f32.mxu0 %vm597_vm0, %v7406_v30 }
 0x187   : > { %4937 = vmatmul.mubr.msk.f32.gmra.mrb[46].mxu1 %vm597_vm0, %v7405_v17  ;;  %5240 = vmatmul.mubr.msk.f32.gmra.mrb[48].mxu0 %vm597_vm0, %v7407_v27 }
 0x188   : > { %4939 = vmatprep.mubr.msk.f32.mxu1 %vm597_vm0, %v7406_v30  ;;  %5242 = vmatprep.mubr.msk.f32.mxu0 %vm597_vm0, %v7408_v15 }
 0x18b   : > { %4940 = vmatmul.mubr.msk.f32.gmra.mrb[48].mxu1 %vm597_vm0, %v7407_v27  ;;  %5243 = vmatmul.mubr.msk.f32.gmra.mrb[50].mxu0 %vm597_vm0, %v7409_v12 }
 0x18c   : > { %4942 = vmatprep.mubr.msk.f32.mxu1 %vm597_vm0, %v7408_v15  ;;  %5245 = vmatprep.mubr.msk.f32.mxu0 %vm597_vm0, %v7410_v13 }
 0x18f   : > { %4943 = vmatmul.mubr.msk.f32.gmra.mrb[50].mxu1 %vm597_vm0, %v7409_v12  ;;  %5246 = vmatmul.mubr.msk.f32.gmra.mrb[52].mxu0 %vm597_vm0, %v7411_v0 }
 0x190   : > { %4945 = vmatprep.mubr.msk.f32.mxu1 %vm597_vm0, %v7410_v13  ;;  %5248 = vmatprep.mubr.msk.f32.mxu0 %vm597_vm0, %v7412_v57 }
 0x193   : > { %4946 = vmatmul.mubr.msk.f32.gmra.mrb[52].mxu1 %vm597_vm0, %v7411_v0  ;;  %5249 = vmatmul.mubr.msk.f32.gmra.mrb[54].mxu0 %vm597_vm0, %v7413_v53 }
 0x194   : > { %4948 = vmatprep.mubr.msk.f32.mxu1 %vm597_vm0, %v7412_v57  ;;  %5251 = vmatprep.mubr.msk.f32.mxu0 %vm597_vm0, %v7414_v41 }
 0x197   : > { %4949 = vmatmul.mubr.msk.f32.gmra.mrb[54].mxu1 %vm597_vm0, %v7413_v53  ;;  %5252 = vmatmul.mubr.msk.f32.gmra.mrb[56].mxu0 %vm597_vm0, %v7415_v54 }
 0x198   : > { %4951 = vmatprep.mubr.msk.f32.mxu1 %vm597_vm0, %v7414_v41  ;;  %5254 = vmatprep.mubr.msk.f32.mxu0 %vm597_vm0, %v7416_v20 }
 0x19b   : > { %4952 = vmatmul.mubr.msk.f32.gmra.mrb[56].mxu1 %vm597_vm0, %v7415_v54  ;;  %5255 = vmatmul.mubr.msk.f32.gmra.mrb[58].mxu0 %vm597_vm0, %v7417_v3 }
 0x19c   : > { %4954 = vmatprep.mubr.msk.f32.mxu1 %vm597_vm0, %v7416_v20  ;;  %5257 = vmatprep.mubr.msk.f32.mxu0 %vm597_vm0, %v7418_v40 }
 0x19f   : > { %4955 = vmatmul.mubr.msk.f32.gmra.mrb[58].mxu1 %vm597_vm0, %v7417_v3  ;;  %5258 = vmatmul.mubr.msk.f32.gmra.mrb[60].mxu0 %vm597_vm0, %v7419_v16 }
 0x1a0   : > { %4957 = vmatprep.mubr.msk.f32.mxu1 %vm597_vm0, %v7418_v40  ;;  %5260 = vmatprep.mubr.msk.f32.mxu0 %vm597_vm0, %v6607_v29  ;;  %v7421_v40 = vld [vmem:[#allocation6_spill] sm:$0xff] }
 0x1a3   : > { %4958 = vmatmul.mubr.msk.f32.gmra.mrb[60].mxu1 %vm597_vm0, %v7419_v16  ;;  %5261 = vmatmul.mubr.msk.f32.gmra.mrb[62].mxu0 %vm597_vm0, %v7420_v44  ;;  %v7422_v16 = vld [vmem:[#allocation8_spill] sm:$0xff] }
 0x1a4   : > { %4960 = vmatprep.mubr.msk.f32.mxu1 %vm597_vm0, %v6607_v29  ;;  %5267 = vmatprep.mubr.msk.f32.mxu0 %vm597_vm0, %v5988_v25  ;;  %v7423_v29 = vld [vmem:[#allocation5_spill] sm:$0xff]  ;;  %v7424_v25 = vld [vmem:[#allocation7_spill] sm:$0xff] }
 0x1a7   : > { %4961 = vmatmul.mubr.msk.f32.gmra.mrb[62].mxu1 %vm597_vm0, %v7420_v44  ;;  %5268 = vmatmul.mubr.msk.f32.vlgmr.msra.gmra.mrb[0].mxu0 %vm597_vm0, %v6004_v35  ;;  %v7425_v35 = vld [vmem:[#allocation10_spill] sm:$0xff] }
 0x1a8   : > { %4967 = vmatprep.mubr.f32.mxu1 %v7421_v40  ;;  %5270 = vmatprep.mubr.msk.f32.mxu0 %vm597_vm0, %v5985_v24  ;;  %v7426_v24 = vld [vmem:[#allocation9_spill] sm:$0xff] }
 0x1a9   : > { %v7468_v40 = vld [vmem:[#allocation57_spill] sm:$0xff] }
 0x1ab   : > { %4968 = vmatmul.mubr.f32.vlgmr.msra.gmra.mrb[0].mxu1 %v7422_v16  ;;  %5271 = vmatmul.mubr.msk.f32.gmra.mrb[2].mxu0 %vm597_vm0, %v6001_v34  ;;  %v7427_v34 = vld [vmem:[#allocation12_spill] sm:$0xff]  ;;  %v7466_v16 = vld [vmem:[#allocation53_spill] sm:$0xff] }
 0x1ac   : > { %4970 = vmatprep.mubr.f32.mxu1 %v7423_v29  ;;  %5273 = vmatprep.mubr.msk.f32.mxu0 %vm597_vm0, %v6023_v46  ;;  %v7428_v46 = vld [vmem:[#allocation11_spill] sm:$0xff]  ;;  %v7467_v29 = vld [vmem:[#allocation58_spill] sm:$0xff] }
 0x1af   : > { %4971 = vmatmul.mubr.f32.gmra.mrb[2].mxu1 %v7424_v25  ;;  %5274 = vmatmul.mubr.msk.f32.gmra.mrb[4].mxu0 %vm597_vm0, %v6020_v45  ;;  %v7429_v45 = vld [vmem:[#allocation14_spill] sm:$0xff]  ;;  %v7487_v25 = vld [vmem:[#allocation89_spill] sm:$0xff] }
 0x1b0   : > { %4973 = vmatprep.mubr.f32.mxu1 %v7425_v35  ;;  %5276 = vmatprep.mubr.msk.f32.mxu0 %vm597_vm0, %v6045_v60  ;;  %v7430_v60 = vld [vmem:[#allocation13_spill] sm:$0xff] }
 0x1b3   : > { %4974 = vmatmul.mubr.f32.gmra.mrb[4].mxu1 %v7426_v24  ;;  %5277 = vmatmul.mubr.msk.f32.gmra.mrb[6].mxu0 %vm597_vm0, %v6042_v59  ;;  %v7431_v59 = vld [vmem:[#allocation16_spill] sm:$0xff] }
 0x1b4   : > { %4976 = vmatprep.mubr.f32.mxu1 %v7427_v34  ;;  %5279 = vmatprep.mubr.msk.f32.mxu0 %vm597_vm0, %v6067_v10  ;;  %v7432_v10 = vld [vmem:[#allocation15_spill] sm:$0xff] }
 0x1b7   : > { %4977 = vmatmul.mubr.f32.gmra.mrb[6].mxu1 %v7428_v46  ;;  %5280 = vmatmul.mubr.msk.f32.gmra.mrb[8].mxu0 %vm597_vm0, %v6064_v9  ;;  %v7433_v9 = vld [vmem:[#allocation18_spill] sm:$0xff] }
 0x1b8   : > { %4979 = vmatprep.mubr.f32.mxu1 %v7429_v45  ;;  %5282 = vmatprep.mubr.msk.f32.mxu0 %vm597_vm0, %v6087_v36  ;;  %v7434_v36 = vld [vmem:[#allocation17_spill] sm:$0xff] }
 0x1bb   : > { %4980 = vmatmul.mubr.f32.gmra.mrb[8].mxu1 %v7430_v60  ;;  %5283 = vmatmul.mubr.msk.f32.gmra.mrb[10].mxu0 %vm597_vm0, %v6084_v32  ;;  %v7435_v32 = vld [vmem:[#allocation20_spill] sm:$0xff] }
 0x1bc   : > { %4982 = vmatprep.mubr.f32.mxu1 %v7431_v59  ;;  %5285 = vmatprep.mubr.msk.f32.mxu0 %vm597_vm0, %v6107_v56  ;;  %v7436_v56 = vld [vmem:[#allocation19_spill] sm:$0xff] }
 0x1bf   : > { %4983 = vmatmul.mubr.f32.gmra.mrb[10].mxu1 %v7432_v10  ;;  %5286 = vmatmul.mubr.msk.f32.gmra.mrb[12].mxu0 %vm597_vm0, %v6104_v55  ;;  %v7437_v55 = vld [vmem:[#allocation22_spill] sm:$0xff] }
 0x1c0   : > { %4985 = vmatprep.mubr.f32.mxu1 %v7433_v9  ;;  %5288 = vmatprep.mubr.msk.f32.mxu0 %vm597_vm0, %v6127_v11  ;;  %v7438_v11 = vld [vmem:[#allocation21_spill] sm:$0xff] }
 0x1c3   : > { %4986 = vmatmul.mubr.f32.gmra.mrb[12].mxu1 %v7434_v36  ;;  %5289 = vmatmul.mubr.msk.f32.gmra.mrb[14].mxu0 %vm597_vm0, %v6124_v8  ;;  %v7439_v8 = vld [vmem:[#allocation24_spill] sm:$0xff] }
 0x1c4   : > { %4988 = vmatprep.mubr.f32.mxu1 %v7435_v32  ;;  %5291 = vmatprep.mubr.msk.f32.mxu0 %vm597_vm0, %v6147_v43  ;;  %v7440_v43 = vld [vmem:[#allocation23_spill] sm:$0xff] }
 0x1c7   : > { %4989 = vmatmul.mubr.f32.gmra.mrb[14].mxu1 %v7436_v56  ;;  %5292 = vmatmul.mubr.msk.f32.gmra.mrb[16].mxu0 %vm597_vm0, %v6144_v42  ;;  %v7441_v42 = vld [vmem:[#allocation26_spill] sm:$0xff] }
 0x1c8   : > { %4991 = vmatprep.mubr.f32.mxu1 %v7437_v55  ;;  %5294 = vmatprep.mubr.msk.f32.mxu0 %vm597_vm0, %v6167_v6  ;;  %v7442_v6 = vld [vmem:[#allocation25_spill] sm:$0xff] }
 0x1cb   : > { %4992 = vmatmul.mubr.f32.gmra.mrb[16].mxu1 %v7438_v11  ;;  %5295 = vmatmul.mubr.msk.f32.gmra.mrb[18].mxu0 %vm597_vm0, %v6164_v5  ;;  %v7443_v5 = vld [vmem:[#allocation28_spill] sm:$0xff] }
 0x1cc   : > { %4994 = vmatprep.mubr.f32.mxu1 %v7439_v8  ;;  %5297 = vmatprep.mubr.msk.f32.mxu0 %vm597_vm0, %v6187_v50  ;;  %v7444_v50 = vld [vmem:[#allocation27_spill] sm:$0xff] }
 0x1cf   : > { %4995 = vmatmul.mubr.f32.gmra.mrb[18].mxu1 %v7440_v43  ;;  %5298 = vmatmul.mubr.msk.f32.gmra.mrb[20].mxu0 %vm597_vm0, %v6184_v49  ;;  %v7445_v49 = vld [vmem:[#allocation30_spill] sm:$0xff] }
 0x1d0   : > { %4997 = vmatprep.mubr.f32.mxu1 %v7441_v42  ;;  %5300 = vmatprep.mubr.msk.f32.mxu0 %vm597_vm0, %v6207_v38  ;;  %v7446_v38 = vld [vmem:[#allocation29_spill] sm:$0xff] }
 0x1d3   : > { %4998 = vmatmul.mubr.f32.gmra.mrb[20].mxu1 %v7442_v6  ;;  %5301 = vmatmul.mubr.msk.f32.gmra.mrb[22].mxu0 %vm597_vm0, %v6204_v37  ;;  %v7447_v37 = vld [vmem:[#allocation32_spill] sm:$0xff] }
 0x1d4   : > { %5000 = vmatprep.mubr.f32.mxu1 %v7443_v5  ;;  %5303 = vmatprep.mubr.msk.f32.mxu0 %vm597_vm0, %v6227_v62  ;;  %v7448_v62 = vld [vmem:[#allocation31_spill] sm:$0xff] }
 0x1d7   : > { %5001 = vmatmul.mubr.f32.gmra.mrb[22].mxu1 %v7444_v50  ;;  %5304 = vmatmul.mubr.msk.f32.gmra.mrb[24].mxu0 %vm597_vm0, %v6224_v61  ;;  %v7449_v61 = vld [vmem:[#allocation34_spill] sm:$0xff] }
 0x1d8   : > { %5003 = vmatprep.mubr.f32.mxu1 %v7445_v49  ;;  %5306 = vmatprep.mubr.msk.f32.mxu0 %vm597_vm0, %v6247_v7  ;;  %v7450_v7 = vld [vmem:[#allocation33_spill] sm:$0xff] }
 0x1db   : > { %5004 = vmatmul.mubr.f32.gmra.mrb[24].mxu1 %v7446_v38  ;;  %5307 = vmatmul.mubr.msk.f32.gmra.mrb[26].mxu0 %vm597_vm0, %v6244_v4  ;;  %v7451_v4 = vld [vmem:[#allocation36_spill] sm:$0xff] }
 0x1dc   : > { %5006 = vmatprep.mubr.f32.mxu1 %v7447_v37  ;;  %5309 = vmatprep.mubr.msk.f32.mxu0 %vm597_vm0, %v6267_v1  ;;  %v7452_v1 = vld [vmem:[#allocation35_spill] sm:$0xff] }
 0x1df   : > { %5007 = vmatmul.mubr.f32.gmra.mrb[26].mxu1 %v7448_v62  ;;  %5310 = vmatmul.mubr.msk.f32.gmra.mrb[28].mxu0 %vm597_vm0, %v6264_v52  ;;  %v7453_v52 = vld [vmem:[#allocation38_spill] sm:$0xff] }
 0x1e0   : > { %5009 = vmatprep.mubr.f32.mxu1 %v7449_v61  ;;  %5312 = vmatprep.mubr.msk.f32.mxu0 %vm597_vm0, %v6287_v48  ;;  %v7454_v48 = vld [vmem:[#allocation37_spill] sm:$0xff] }
 0x1e3   : > { %5010 = vmatmul.mubr.f32.gmra.mrb[28].mxu1 %v7450_v7  ;;  %5313 = vmatmul.mubr.msk.f32.gmra.mrb[30].mxu0 %vm597_vm0, %v6284_v14  ;;  %v7455_v14 = vld [vmem:[#allocation40_spill] sm:$0xff] }
 0x1e4   : > { %5012 = vmatprep.mubr.f32.mxu1 %v7451_v4  ;;  %5315 = vmatprep.mubr.msk.f32.mxu0 %vm597_vm0, %v6307_v31  ;;  %v7456_v31 = vld [vmem:[#allocation39_spill] sm:$0xff] }
 0x1e7   : > { %5013 = vmatmul.mubr.f32.gmra.mrb[30].mxu1 %v7452_v1  ;;  %5316 = vmatmul.mubr.msk.f32.gmra.mrb[32].mxu0 %vm597_vm0, %v6304_v63  ;;  %v7457_v63 = vld [vmem:[#allocation42_spill] sm:$0xff] }
 0x1e8   : > { %5015 = vmatprep.mubr.f32.mxu1 %v7453_v52  ;;  %5318 = vmatprep.mubr.msk.f32.mxu0 %vm597_vm0, %v6327_v18  ;;  %v7458_v18 = vld [vmem:[#allocation41_spill] sm:$0xff] }
 0x1eb   : > { %5016 = vmatmul.mubr.f32.gmra.mrb[32].mxu1 %v7454_v48  ;;  %5319 = vmatmul.mubr.msk.f32.gmra.mrb[34].mxu0 %vm597_vm0, %v6324_v51  ;;  %v7459_v51 = vld [vmem:[#allocation44_spill] sm:$0xff] }
 0x1ec   : > { %5018 = vmatprep.mubr.f32.mxu1 %v7455_v14  ;;  %5321 = vmatprep.mubr.msk.f32.mxu0 %vm597_vm0, %v6347_v58  ;;  %v7460_v58 = vld [vmem:[#allocation43_spill] sm:$0xff] }
 0x1ef   : > { %5019 = vmatmul.mubr.f32.gmra.mrb[34].mxu1 %v7456_v31  ;;  %5322 = vmatmul.mubr.msk.f32.gmra.mrb[36].mxu0 %vm597_vm0, %v6344_v39  ;;  %v7461_v39 = vld [vmem:[#allocation46_spill] sm:$0xff] }
 0x1f0   : > { %5021 = vmatprep.mubr.f32.mxu1 %v7457_v63  ;;  %5324 = vmatprep.mubr.msk.f32.mxu0 %vm597_vm0, %v6367_v26  ;;  %v7462_v26 = vld [vmem:[#allocation45_spill] sm:$0xff] }
 0x1f3   : > { %5022 = vmatmul.mubr.f32.gmra.mrb[36].mxu1 %v7458_v18  ;;  %5325 = vmatmul.mubr.msk.f32.gmra.mrb[38].mxu0 %vm597_vm0, %v6364_v33  ;;  %v7463_v33 = vld [vmem:[#allocation50_spill] sm:$0xff] }
 0x1f4   : > { %5024 = vmatprep.mubr.f32.mxu1 %v7459_v51  ;;  %5327 = vmatprep.mubr.msk.f32.mxu0 %vm597_vm0, %v6387_v28  ;;  %v7464_v28 = vld [vmem:[#allocation49_spill] sm:$0xff] }
 0x1f7   : > { %5025 = vmatmul.mubr.f32.gmra.mrb[38].mxu1 %v7460_v58  ;;  %5328 = vmatmul.mubr.msk.f32.gmra.mrb[40].mxu0 %vm597_vm0, %v6384_v23  ;;  %v7465_v23 = vld [vmem:[#allocation54_spill] sm:$0xff] }
 0x1f8   : > { %5027 = vmatprep.mubr.f32.mxu1 %v7461_v39  ;;  %5330 = vmatprep.mubr.msk.f32.mxu0 %vm597_vm0, %v7400_v19  ;;  %v7469_v19 = vld [vmem:[#allocation62_spill] sm:$0xff] }
 0x1fb   : > { %5028 = vmatmul.mubr.f32.gmra.mrb[40].mxu1 %v7462_v26  ;;  %5331 = vmatmul.mubr.msk.f32.gmra.mrb[42].mxu0 %vm597_vm0, %v7401_v21  ;;  %v7470_v21 = vld [vmem:[#allocation61_spill] sm:$0xff] }
 0x1fc   : > { %5030 = vmatprep.mubr.f32.mxu1 %v7463_v33  ;;  %5333 = vmatprep.mubr.msk.f32.mxu0 %vm597_vm0, %v7402_v47  ;;  %v7471_v47 = vld [vmem:[#allocation66_spill] sm:$0xff] }
 0x1ff   : > { %5031 = vmatmul.mubr.f32.gmra.mrb[42].mxu1 %v7464_v28  ;;  %5334 = vmatmul.mubr.msk.f32.gmra.mrb[44].mxu0 %vm597_vm0, %v7403_v22  ;;  %v7472_v22 = vld [vmem:[#allocation65_spill] sm:$0xff] }
 0x200   : > { %5033 = vmatprep.mubr.f32.mxu1 %v7465_v23  ;;  %5336 = vmatprep.mubr.msk.f32.mxu0 %vm597_vm0, %v7404_v2  ;;  %v7473_v2 = vld [vmem:[#allocation70_spill] sm:$0xff] }
 0x203   : > { %5034 = vmatmul.mubr.f32.gmra.mrb[44].mxu1 %v7466_v16  ;;  %5337 = vmatmul.mubr.msk.f32.gmra.mrb[46].mxu0 %vm597_vm0, %v7405_v17  ;;  %v7474_v17 = vld [vmem:[#allocation69_spill] sm:$0xff] }
 0x204   : > { %5036 = vmatprep.mubr.f32.mxu1 %v7467_v29  ;;  %5339 = vmatprep.mubr.msk.f32.mxu0 %vm597_vm0, %v7406_v30  ;;  %v7475_v30 = vld [vmem:[#allocation74_spill] sm:$0xff] }
 0x207   : > { %5037 = vmatmul.mubr.f32.gmra.mrb[46].mxu1 %v7468_v40  ;;  %5340 = vmatmul.mubr.msk.f32.gmra.mrb[48].mxu0 %vm597_vm0, %v7407_v27  ;;  %v7476_v27 = vld [vmem:[#allocation73_spill] sm:$0xff] }
 0x208   : > { %5039 = vmatprep.mubr.f32.mxu1 %v7469_v19  ;;  %5342 = vmatprep.mubr.msk.f32.mxu0 %vm597_vm0, %v7408_v15  ;;  %v7477_v15 = vld [vmem:[#allocation78_spill] sm:$0xff] }
 0x20b   : > { %5040 = vmatmul.mubr.f32.gmra.mrb[48].mxu1 %v7470_v21  ;;  %5343 = vmatmul.mubr.msk.f32.gmra.mrb[50].mxu0 %vm597_vm0, %v7409_v12  ;;  %v7478_v12 = vld [vmem:[#allocation77_spill] sm:$0xff] }
 0x20c   : > { %5042 = vmatprep.mubr.f32.mxu1 %v7471_v47  ;;  %5345 = vmatprep.mubr.msk.f32.mxu0 %vm597_vm0, %v7410_v13  ;;  %v7479_v13 = vld [vmem:[#allocation82_spill] sm:$0xff] }
 0x20f   : > { %5043 = vmatmul.mubr.f32.gmra.mrb[50].mxu1 %v7472_v22  ;;  %5346 = vmatmul.mubr.msk.f32.gmra.mrb[52].mxu0 %vm597_vm0, %v7411_v0  ;;  %v7480_v0 = vld [vmem:[#allocation84_spill] sm:$0xff] }
 0x210   : > { %5045 = vmatprep.mubr.f32.mxu1 %v7473_v2  ;;  %5348 = vmatprep.mubr.msk.f32.mxu0 %vm597_vm0, %v7412_v57  ;;  %v7481_v57 = vld [vmem:[#allocation81_spill] sm:$0xff] }
 0x213   : > { %5046 = vmatmul.mubr.f32.gmra.mrb[52].mxu1 %v7474_v17  ;;  %5349 = vmatmul.mubr.msk.f32.gmra.mrb[54].mxu0 %vm597_vm0, %v7413_v53  ;;  %v7482_v53 = vld [vmem:[#allocation83_spill] sm:$0xff] }
 0x214   : > { %5048 = vmatprep.mubr.f32.mxu1 %v7475_v30  ;;  %5351 = vmatprep.mubr.msk.f32.mxu0 %vm597_vm0, %v7414_v41  ;;  %v7483_v41 = vld [vmem:[#allocation86_spill] sm:$0xff] }
 0x217   : > { %5049 = vmatmul.mubr.f32.gmra.mrb[54].mxu1 %v7476_v27  ;;  %5352 = vmatmul.mubr.msk.f32.gmra.mrb[56].mxu0 %vm597_vm0, %v7415_v54  ;;  %v7484_v54 = vld [vmem:[#allocation88_spill] sm:$0xff] }
 0x218   : > { %5051 = vmatprep.mubr.f32.mxu1 %v7477_v15  ;;  %5354 = vmatprep.mubr.msk.f32.mxu0 %vm597_vm0, %v7416_v20  ;;  %v7485_v20 = vld [vmem:[#allocation85_spill] sm:$0xff] }
 0x21b   : > { %5052 = vmatmul.mubr.f32.gmra.mrb[56].mxu1 %v7478_v12  ;;  %5355 = vmatmul.mubr.msk.f32.gmra.mrb[58].mxu0 %vm597_vm0, %v7417_v3  ;;  %v7486_v3 = vld [vmem:[#allocation90_spill] sm:$0xff] }
 0x21c   : > { %5054 = vmatprep.mubr.f32.mxu1 %v7479_v13  ;;  %5357 = vmatprep.mubr.msk.f32.mxu0 %vm597_vm0, %v7480_v0 }
 0x21f   : > { %5055 = vmatmul.mubr.f32.gmra.mrb[58].mxu1 %v7481_v57  ;;  %5358 = vmatmul.mubr.msk.f32.gmra.mrb[60].mxu0 %vm597_vm0, %v7482_v53 }
 0x220   : > { %5057 = vmatprep.mubr.f32.mxu1 %v7483_v41  ;;  %5360 = vmatprep.mubr.msk.f32.mxu0 %vm597_vm0, %v7484_v54 }
 0x223   : > { %5058 = vmatmul.mubr.f32.gmra.mrb[60].mxu1 %v7485_v20  ;;  %5361 = vmatmul.mubr.msk.f32.gmra.mrb[62].mxu0 %vm597_vm0, %v7420_v44 }
 0x224   : > { %5060 = vmatprep.mubr.f32.mxu1 %v7486_v3 }
 0x227   : > { %5061 = vmatmul.mubr.f32.gmra.mrb[62].mxu1 %v7487_v25 }
 0x27a   : > { %v5269_v35 = vpop.f32.mrb[0].mxu0 }
 0x27b   : > { %v3576_v24 = vpop.f32.mrb[1].mxu0 }
 0x27e   : > { %v4969_v34 = vpop.f32.mrb[0].mxu1  ;;  %v5272_v46 = vpop.f32.mrb[2].mxu0 }
 0x27f   : > { %v5387_v45 = vadd.f32 %v5269_v35, %v4969_v34  ;;  %v2028_v60 = vpop.f32.mrb[1].mxu1  ;;  %v3588_v59 = vpop.f32.mrb[3].mxu0 }
 0x280   : > { %v5388_v10 = vadd.f32 %v3576_v24, %v2028_v60 }
 0x281   : > { %3959 = vst [vmem:[%s7079_s4 + $0x8] sm:$0xff] %v5387_v45 }
 0x282   : > { %3958 = vst [vmem:[%s7079_s4] sm:$0xff] %v5388_v10  ;;  %v4972_v44 = vpop.f32.mrb[2].mxu1  ;;  %v5275_v9 = vpop.f32.mrb[4].mxu0 }
 0x283   : > { %v5389_v36 = vadd.f32 %v5272_v46, %v4972_v44  ;;  %v2042_v32 = vpop.f32.mrb[3].mxu1  ;;  %v3600_v56 = vpop.f32.mrb[5].mxu0 }
 0x284   : > { %v5390_v55 = vadd.f32 %v3588_v59, %v2042_v32 }
 0x285   : > { %3961 = vst [vmem:[%s7079_s4 + $0x18] sm:$0xff] %v5389_v36 }
 0x286   : > { %3960 = vst [vmem:[%s7079_s4 + $0x10] sm:$0xff] %v5390_v55  ;;  %v4975_v11 = vpop.f32.mrb[4].mxu1  ;;  %v5278_v8 = vpop.f32.mrb[6].mxu0 }
 0x287   : > { %v5391_v43 = vadd.f32 %v5275_v9, %v4975_v11  ;;  %v2056_v42 = vpop.f32.mrb[5].mxu1  ;;  %v3612_v6 = vpop.f32.mrb[7].mxu0 }
 0x288   : > { %v5392_v5 = vadd.f32 %v3600_v56, %v2056_v42 }
 0x289   : > { %3963 = vst [vmem:[%s7079_s4 + $0x28] sm:$0xff] %v5391_v43 }
 0x28a   : > { %3962 = vst [vmem:[%s7079_s4 + $0x20] sm:$0xff] %v5392_v5  ;;  %v4978_v50 = vpop.f32.mrb[6].mxu1  ;;  %v5281_v49 = vpop.f32.mrb[8].mxu0 }
 0x28b   : > { %v5393_v38 = vadd.f32 %v5278_v8, %v4978_v50  ;;  %v2070_v37 = vpop.f32.mrb[7].mxu1  ;;  %v3624_v62 = vpop.f32.mrb[9].mxu0 }
 0x28c   : > { %v5394_v61 = vadd.f32 %v3612_v6, %v2070_v37 }
 0x28d   : > { %3965 = vst [vmem:[%s7079_s4 + $0x38] sm:$0xff] %v5393_v38 }
 0x28e   : > { %3964 = vst [vmem:[%s7079_s4 + $0x30] sm:$0xff] %v5394_v61  ;;  %v4981_v7 = vpop.f32.mrb[8].mxu1  ;;  %v5284_v4 = vpop.f32.mrb[10].mxu0 }
 0x28f   : > { %v5395_v1 = vadd.f32 %v5281_v49, %v4981_v7  ;;  %v2084_v52 = vpop.f32.mrb[9].mxu1  ;;  %v3636_v48 = vpop.f32.mrb[11].mxu0 }
 0x290   : > { %v5396_v14 = vadd.f32 %v3624_v62, %v2084_v52 }
 0x291   : > { %3967 = vst [vmem:[%s7079_s4 + $0x48] sm:$0xff] %v5395_v1 }
 0x292   : > { %3966 = vst [vmem:[%s7079_s4 + $0x40] sm:$0xff] %v5396_v14  ;;  %v4984_v31 = vpop.f32.mrb[10].mxu1  ;;  %v5287_v63 = vpop.f32.mrb[12].mxu0 }
 0x293   : > { %v5397_v18 = vadd.f32 %v5284_v4, %v4984_v31  ;;  %v2098_v51 = vpop.f32.mrb[11].mxu1  ;;  %v3648_v58 = vpop.f32.mrb[13].mxu0 }
 0x294   : > { %v5398_v39 = vadd.f32 %v3636_v48, %v2098_v51 }
 0x295   : > { %3969 = vst [vmem:[%s7079_s4 + $0x58] sm:$0xff] %v5397_v18 }
 0x296   : > { %3968 = vst [vmem:[%s7079_s4 + $0x50] sm:$0xff] %v5398_v39  ;;  %v4987_v26 = vpop.f32.mrb[12].mxu1  ;;  %v5290_v33 = vpop.f32.mrb[14].mxu0 }
 0x297   : > { %v5399_v28 = vadd.f32 %v5287_v63, %v4987_v26  ;;  %v2112_v23 = vpop.f32.mrb[13].mxu1  ;;  %v3660_v16 = vpop.f32.mrb[15].mxu0 }
 0x298   : > { %v5400_v29 = vadd.f32 %v3648_v58, %v2112_v23 }
 0x299   : > { %3971 = vst [vmem:[%s7079_s4 + $0x68] sm:$0xff] %v5399_v28 }
 0x29a   : > { %3970 = vst [vmem:[%s7079_s4 + $0x60] sm:$0xff] %v5400_v29  ;;  %v4990_v40 = vpop.f32.mrb[14].mxu1  ;;  %v5293_v19 = vpop.f32.mrb[16].mxu0 }
 0x29b   : > { %v5401_v21 = vadd.f32 %v5290_v33, %v4990_v40  ;;  %v2126_v47 = vpop.f32.mrb[15].mxu1  ;;  %v3672_v22 = vpop.f32.mrb[17].mxu0 }
 0x29c   : > { %v5402_v2 = vadd.f32 %v3660_v16, %v2126_v47 }
 0x29d   : > { %3973 = vst [vmem:[%s7079_s4 + $0x78] sm:$0xff] %v5401_v21 }
 0x29e   : > { %3972 = vst [vmem:[%s7079_s4 + $0x70] sm:$0xff] %v5402_v2  ;;  %v4993_v17 = vpop.f32.mrb[16].mxu1  ;;  %v5296_v30 = vpop.f32.mrb[18].mxu0 }
 0x29f   : > { %v5403_v27 = vadd.f32 %v5293_v19, %v4993_v17  ;;  %v2140_v15 = vpop.f32.mrb[17].mxu1  ;;  %v3684_v12 = vpop.f32.mrb[19].mxu0 }
 0x2a0   : > { %v5404_v13 = vadd.f32 %v3672_v22, %v2140_v15 }
 0x2a1   : > { %3975 = vst [vmem:[%s7079_s4 + $0x88] sm:$0xff] %v5403_v27 }
 0x2a2   : > { %3974 = vst [vmem:[%s7079_s4 + $0x80] sm:$0xff] %v5404_v13  ;;  %v4996_v0 = vpop.f32.mrb[18].mxu1  ;;  %v5299_v57 = vpop.f32.mrb[20].mxu0 }
 0x2a3   : > { %v5405_v53 = vadd.f32 %v5296_v30, %v4996_v0  ;;  %v2154_v41 = vpop.f32.mrb[19].mxu1  ;;  %v3696_v54 = vpop.f32.mrb[21].mxu0 }
 0x2a4   : > { %v5406_v20 = vadd.f32 %v3684_v12, %v2154_v41 }
 0x2a5   : > { %3977 = vst [vmem:[%s7079_s4 + $0x98] sm:$0xff] %v5405_v53 }
 0x2a6   : > { %3976 = vst [vmem:[%s7079_s4 + $0x90] sm:$0xff] %v5406_v20  ;;  %v4999_v3 = vpop.f32.mrb[20].mxu1  ;;  %v5302_v25 = vpop.f32.mrb[22].mxu0 }
 0x2a7   : > { %v5407_v35 = vadd.f32 %v5299_v57, %v4999_v3  ;;  %v2168_v24 = vpop.f32.mrb[21].mxu1  ;;  %v3708_v34 = vpop.f32.mrb[23].mxu0 }
 0x2a8   : > { %v5408_v46 = vadd.f32 %v3696_v54, %v2168_v24 }
 0x2a9   : > { %3979 = vst [vmem:[%s7079_s4 + $0xa8] sm:$0xff] %v5407_v35 }
 0x2aa   : > { %3978 = vst [vmem:[%s7079_s4 + $0xa0] sm:$0xff] %v5408_v46  ;;  %v5002_v45 = vpop.f32.mrb[22].mxu1  ;;  %v5305_v60 = vpop.f32.mrb[24].mxu0 }
 0x2ab   : > { %v5409_v59 = vadd.f32 %v5302_v25, %v5002_v45  ;;  %v2182_v10 = vpop.f32.mrb[23].mxu1  ;;  %v3720_v44 = vpop.f32.mrb[25].mxu0 }
 0x2ac   : > { %v5410_v9 = vadd.f32 %v3708_v34, %v2182_v10 }
 0x2ad   : > { %3981 = vst [vmem:[%s7079_s4 + $0xb8] sm:$0xff] %v5409_v59 }
 0x2ae   : > { %3980 = vst [vmem:[%s7079_s4 + $0xb0] sm:$0xff] %v5410_v9  ;;  %v5005_v36 = vpop.f32.mrb[24].mxu1  ;;  %v5308_v32 = vpop.f32.mrb[26].mxu0 }
 0x2af   : > { %v5411_v56 = vadd.f32 %v5305_v60, %v5005_v36  ;;  %v2196_v55 = vpop.f32.mrb[25].mxu1  ;;  %v3732_v11 = vpop.f32.mrb[27].mxu0 }
 0x2b0   : > { %v5412_v8 = vadd.f32 %v3720_v44, %v2196_v55 }
 0x2b1   : > { %3983 = vst [vmem:[%s7079_s4 + $0xc8] sm:$0xff] %v5411_v56 }
 0x2b2   : > { %3982 = vst [vmem:[%s7079_s4 + $0xc0] sm:$0xff] %v5412_v8  ;;  %v5008_v43 = vpop.f32.mrb[26].mxu1  ;;  %v5311_v42 = vpop.f32.mrb[28].mxu0 }
 0x2b3   : > { %v5413_v6 = vadd.f32 %v5308_v32, %v5008_v43  ;;  %v2210_v5 = vpop.f32.mrb[27].mxu1  ;;  %v3744_v50 = vpop.f32.mrb[29].mxu0 }
 0x2b4   : > { %v5414_v49 = vadd.f32 %v3732_v11, %v2210_v5 }
 0x2b5   : > { %3985 = vst [vmem:[%s7079_s4 + $0xd8] sm:$0xff] %v5413_v6 }
 0x2b6   : > { %3984 = vst [vmem:[%s7079_s4 + $0xd0] sm:$0xff] %v5414_v49  ;;  %v5011_v38 = vpop.f32.mrb[28].mxu1  ;;  %v5314_v37 = vpop.f32.mrb[30].mxu0 }
 0x2b7   : > { %v5415_v62 = vadd.f32 %v5311_v42, %v5011_v38  ;;  %v2224_v61 = vpop.f32.mrb[29].mxu1  ;;  %v3756_v7 = vpop.f32.mrb[31].mxu0 }
 0x2b8   : > { %v5416_v4 = vadd.f32 %v3744_v50, %v2224_v61 }
 0x2b9   : > { %3987 = vst [vmem:[%s7079_s4 + $0xe8] sm:$0xff] %v5415_v62 }
 0x2ba   : > { %3986 = vst [vmem:[%s7079_s4 + $0xe0] sm:$0xff] %v5416_v4  ;;  %v5014_v1 = vpop.f32.mrb[30].mxu1  ;;  %v5317_v52 = vpop.f32.mrb[32].mxu0 }
 0x2bb   : > { %v5417_v48 = vadd.f32 %v5314_v37, %v5014_v1  ;;  %v2238_v14 = vpop.f32.mrb[31].mxu1  ;;  %v3768_v31 = vpop.f32.mrb[33].mxu0 }
 0x2bc   : > { %v5418_v63 = vadd.f32 %v3756_v7, %v2238_v14 }
 0x2bd   : > { %3989 = vst [vmem:[%s7079_s4 + $0xf8] sm:$0xff] %v5417_v48 }
 0x2be   : > { %3988 = vst [vmem:[%s7079_s4 + $0xf0] sm:$0xff] %v5418_v63  ;;  %v5017_v18 = vpop.f32.mrb[32].mxu1  ;;  %v5320_v51 = vpop.f32.mrb[34].mxu0 }
 0x2bf   : > { %v5419_v58 = vadd.f32 %v5317_v52, %v5017_v18  ;;  %v2252_v39 = vpop.f32.mrb[33].mxu1  ;;  %v3780_v26 = vpop.f32.mrb[35].mxu0 }
 0x2c0   : > { %v5420_v33 = vadd.f32 %v3768_v31, %v2252_v39 }
 0x2c1   : > { %3991 = vst [vmem:[%s7079_s4 + $0x108] sm:$0xff] %v5419_v58 }
 0x2c2   : > { %3990 = vst [vmem:[%s7079_s4 + $0x100] sm:$0xff] %v5420_v33  ;;  %v5020_v28 = vpop.f32.mrb[34].mxu1  ;;  %v5323_v23 = vpop.f32.mrb[36].mxu0 }
 0x2c3   : > { %v5421_v16 = vadd.f32 %v5320_v51, %v5020_v28  ;;  %v2266_v29 = vpop.f32.mrb[35].mxu1  ;;  %v3792_v40 = vpop.f32.mrb[37].mxu0 }
 0x2c4   : > { %v5422_v19 = vadd.f32 %v3780_v26, %v2266_v29 }
 0x2c5   : > { %3993 = vst [vmem:[%s7079_s4 + $0x118] sm:$0xff] %v5421_v16 }
 0x2c6   : > { %3992 = vst [vmem:[%s7079_s4 + $0x110] sm:$0xff] %v5422_v19  ;;  %v5023_v21 = vpop.f32.mrb[36].mxu1  ;;  %v5326_v47 = vpop.f32.mrb[38].mxu0 }
 0x2c7   : > { %v5423_v22 = vadd.f32 %v5323_v23, %v5023_v21  ;;  %v2280_v2 = vpop.f32.mrb[37].mxu1  ;;  %v3804_v17 = vpop.f32.mrb[39].mxu0 }
 0x2c8   : > { %v5424_v30 = vadd.f32 %v3792_v40, %v2280_v2 }
 0x2c9   : > { %3995 = vst [vmem:[%s7079_s4 + $0x128] sm:$0xff] %v5423_v22 }
 0x2ca   : > { %3994 = vst [vmem:[%s7079_s4 + $0x120] sm:$0xff] %v5424_v30  ;;  %v5026_v27 = vpop.f32.mrb[38].mxu1  ;;  %v5329_v15 = vpop.f32.mrb[40].mxu0 }
 0x2cb   : > { %v5425_v12 = vadd.f32 %v5326_v47, %v5026_v27  ;;  %v2294_v13 = vpop.f32.mrb[39].mxu1  ;;  %v3816_v0 = vpop.f32.mrb[41].mxu0 }
 0x2cc   : > { %v5426_v57 = vadd.f32 %v3804_v17, %v2294_v13 }
 0x2cd   : > { %3997 = vst [vmem:[%s7079_s4 + $0x138] sm:$0xff] %v5425_v12 }
 0x2ce   : > { %3996 = vst [vmem:[%s7079_s4 + $0x130] sm:$0xff] %v5426_v57  ;;  %v5029_v53 = vpop.f32.mrb[40].mxu1  ;;  %v5332_v41 = vpop.f32.mrb[42].mxu0 }
 0x2cf   : > { %v5427_v54 = vadd.f32 %v5329_v15, %v5029_v53  ;;  %v2308_v20 = vpop.f32.mrb[41].mxu1  ;;  %v3828_v3 = vpop.f32.mrb[43].mxu0 }
 0x2d0   : > { %v5428_v25 = vadd.f32 %v3816_v0, %v2308_v20 }
 0x2d1   : > { %3999 = vst [vmem:[%s7079_s4 + $0x148] sm:$0xff] %v5427_v54 }
 0x2d2   : > { %3998 = vst [vmem:[%s7079_s4 + $0x140] sm:$0xff] %v5428_v25  ;;  %v5032_v35 = vpop.f32.mrb[42].mxu1  ;;  %v5335_v24 = vpop.f32.mrb[44].mxu0 }
 0x2d3   : > { %v5429_v34 = vadd.f32 %v5332_v41, %v5032_v35  ;;  %v2322_v46 = vpop.f32.mrb[43].mxu1  ;;  %v3840_v45 = vpop.f32.mrb[45].mxu0 }
 0x2d4   : > { %v5430_v60 = vadd.f32 %v3828_v3, %v2322_v46 }
 0x2d5   : > { %4001 = vst [vmem:[%s7079_s4 + $0x158] sm:$0xff] %v5429_v34 }
 0x2d6   : > { %4000 = vst [vmem:[%s7079_s4 + $0x150] sm:$0xff] %v5430_v60  ;;  %v5035_v59 = vpop.f32.mrb[44].mxu1  ;;  %v5338_v10 = vpop.f32.mrb[46].mxu0 }
 0x2d7   : > { %v5431_v44 = vadd.f32 %v5335_v24, %v5035_v59  ;;  %v2336_v9 = vpop.f32.mrb[45].mxu1  ;;  %v3852_v36 = vpop.f32.mrb[47].mxu0 }
 0x2d8   : > { %v5432_v32 = vadd.f32 %v3840_v45, %v2336_v9 }
 0x2d9   : > { %4003 = vst [vmem:[%s7079_s4 + $0x168] sm:$0xff] %v5431_v44 }
 0x2da   : > { %4002 = vst [vmem:[%s7079_s4 + $0x160] sm:$0xff] %v5432_v32  ;;  %v5038_v56 = vpop.f32.mrb[46].mxu1  ;;  %v5341_v55 = vpop.f32.mrb[48].mxu0 }
 0x2db   : > { %v5433_v11 = vadd.f32 %v5338_v10, %v5038_v56  ;;  %v2350_v8 = vpop.f32.mrb[47].mxu1  ;;  %v3864_v43 = vpop.f32.mrb[49].mxu0 }
 0x2dc   : > { %v5434_v42 = vadd.f32 %v3852_v36, %v2350_v8 }
 0x2dd   : > { %4005 = vst [vmem:[%s7079_s4 + $0x178] sm:$0xff] %v5433_v11 }
 0x2de   : > { %4004 = vst [vmem:[%s7079_s4 + $0x170] sm:$0xff] %v5434_v42  ;;  %v5041_v6 = vpop.f32.mrb[48].mxu1  ;;  %v5344_v5 = vpop.f32.mrb[50].mxu0 }
 0x2df   : > { %v5435_v50 = vadd.f32 %v5341_v55, %v5041_v6  ;;  %v2364_v49 = vpop.f32.mrb[49].mxu1  ;;  %v3876_v38 = vpop.f32.mrb[51].mxu0 }
 0x2e0   : > { %v5436_v37 = vadd.f32 %v3864_v43, %v2364_v49 }
 0x2e1   : > { %4007 = vst [vmem:[%s7079_s4 + $0x188] sm:$0xff] %v5435_v50 }
 0x2e2   : > { %4006 = vst [vmem:[%s7079_s4 + $0x180] sm:$0xff] %v5436_v37  ;;  %v5044_v62 = vpop.f32.mrb[50].mxu1  ;;  %v5347_v61 = vpop.f32.mrb[52].mxu0 }
 0x2e3   : > { %v5437_v7 = vadd.f32 %v5344_v5, %v5044_v62  ;;  %v2378_v4 = vpop.f32.mrb[51].mxu1  ;;  %v3888_v1 = vpop.f32.mrb[53].mxu0 }
 0x2e4   : > { %v5438_v52 = vadd.f32 %v3876_v38, %v2378_v4 }
 0x2e5   : > { %4009 = vst [vmem:[%s7079_s4 + $0x198] sm:$0xff] %v5437_v7 }
 0x2e6   : > { %4008 = vst [vmem:[%s7079_s4 + $0x190] sm:$0xff] %v5438_v52  ;;  %v5047_v48 = vpop.f32.mrb[52].mxu1  ;;  %v5350_v14 = vpop.f32.mrb[54].mxu0 }
 0x2e7   : > { %v5439_v31 = vadd.f32 %v5347_v61, %v5047_v48  ;;  %v2392_v63 = vpop.f32.mrb[53].mxu1  ;;  %v3900_v18 = vpop.f32.mrb[55].mxu0 }
 0x2e8   : > { %v5440_v51 = vadd.f32 %v3888_v1, %v2392_v63 }
 0x2e9   : > { %4011 = vst [vmem:[%s7079_s4 + $0x1a8] sm:$0xff] %v5439_v31 }
 0x2ea   : > { %4010 = vst [vmem:[%s7079_s4 + $0x1a0] sm:$0xff] %v5440_v51  ;;  %v5050_v58 = vpop.f32.mrb[54].mxu1  ;;  %v5353_v39 = vpop.f32.mrb[56].mxu0 }
 0x2eb   : > { %v5441_v26 = vadd.f32 %v5350_v14, %v5050_v58  ;;  %v2406_v33 = vpop.f32.mrb[55].mxu1  ;;  %v3912_v28 = vpop.f32.mrb[57].mxu0 }
 0x2ec   : > { %v5442_v23 = vadd.f32 %v3900_v18, %v2406_v33 }
 0x2ed   : > { %4013 = vst [vmem:[%s7079_s4 + $0x1b8] sm:$0xff] %v5441_v26 }
 0x2ee   : > { %4012 = vst [vmem:[%s7079_s4 + $0x1b0] sm:$0xff] %v5442_v23  ;;  %v5053_v16 = vpop.f32.mrb[56].mxu1  ;;  %v5356_v29 = vpop.f32.mrb[58].mxu0 }
 0x2ef   : > { %v5443_v40 = vadd.f32 %v5353_v39, %v5053_v16  ;;  %v2420_v19 = vpop.f32.mrb[57].mxu1  ;;  %v3924_v21 = vpop.f32.mrb[59].mxu0 }
 0x2f0   : > { %v5444_v47 = vadd.f32 %v3912_v28, %v2420_v19 }
 0x2f1   : > { %4015 = vst [vmem:[%s7079_s4 + $0x1c8] sm:$0xff] %v5443_v40 }
 0x2f2   : > { %4014 = vst [vmem:[%s7079_s4 + $0x1c0] sm:$0xff] %v5444_v47  ;;  %v5056_v22 = vpop.f32.mrb[58].mxu1  ;;  %v5359_v2 = vpop.f32.mrb[60].mxu0 }
 0x2f3   : > { %v5445_v17 = vadd.f32 %v5356_v29, %v5056_v22  ;;  %v2434_v30 = vpop.f32.mrb[59].mxu1  ;;  %v3936_v27 = vpop.f32.mrb[61].mxu0 }
 0x2f4   : > { %v5446_v15 = vadd.f32 %v3924_v21, %v2434_v30 }
 0x2f5   : > { %4017 = vst [vmem:[%s7079_s4 + $0x1d8] sm:$0xff] %v5445_v17 }
 0x2f6   : > { %4016 = vst [vmem:[%s7079_s4 + $0x1d0] sm:$0xff] %v5446_v15  ;;  %v5059_v12 = vpop.f32.mrb[60].mxu1  ;;  %v5362_v13 = vpop.f32.mrb[62].mxu0 }
 0x2f7   : > { %v5447_v0 = vadd.f32 %v5359_v2, %v5059_v12  ;;  %v2448_v57 = vpop.f32.mrb[61].mxu1  ;;  %v3948_v53 = vpop.f32.mrb[63].mxu0 }
 0x2f8   : > { %v5448_v41 = vadd.f32 %v3936_v27, %v2448_v57 }
 0x2f9   : > { %4019 = vst [vmem:[%s7079_s4 + $0x1e8] sm:$0xff] %v5447_v0 }
 0x2fa   : > { %4018 = vst [vmem:[%s7079_s4 + $0x1e0] sm:$0xff] %v5448_v41  ;;  %v5062_v54 = vpop.f32.mrb[62].mxu1 }
 0x2fb   : > { %v5449_v20 = vadd.f32 %v5362_v13, %v5062_v54  ;;  %v2462_v3 = vpop.f32.mrb[63].mxu1 }
 0x2fc   : > { %v5450_v25 = vadd.f32 %v3948_v53, %v2462_v3 }
 0x2fd   : > { %4021 = vst [vmem:[%s7079_s4 + $0x1f8] sm:$0xff] %v5449_v20 }
 0x2fe   : > { %4020 = vst [vmem:[%s7079_s4 + $0x1f0] sm:$0xff] %v5450_v25 }
 0x2ff   : > { %5765 = shalt.err (!%p5762_p3)
}
 0x300   : > { %s5766_s23 = scalar_lea.hbm %s7148_s14, 8192  ;;  %s5770_s26 = scalar_lea.hbm %s7199_s2, 16384 }
 0x301   : > { %p5767_p4 = scmp.ne.s32.totalorder %s7148_s14, %s5766_s23  ;;  %p5771_p9 = scmp.lt.u32.totalorder %s7148_s14, %s7199_s2 }
 0x302   : > { %p5772_p10 = scmp.lt.u32.totalorder %s5770_s26, %s5766_s23  ;;  %p5774_p12 = scmp.lt.u32.totalorder %s5766_s23, %s7148_s14 }
 0x303   : > { %p5768_p7 = pnand %p5767_p4, %p5874_p5 }
 0x304   : > { %p5773_p11 = por %p5772_p10, %p5771_p9 }
 0x305   : > { %p5769_p8 = pneg %p5768_p7 }
 0x306   : > { %p5775_p13 = por %p5774_p12, %p5773_p11 }
 0x308   : > { %p5776_p0 = pnand %p5775_p13, %p5769_p8 }
 0x30a   : > { %5779 = shalt.err (!%p5776_p0)
}
 0x30b   : > { %s5819_s29 = smov 128   ;;  %s5820_s30 = smov 8  }
 0x30c   : > { %5707 = dma.vmem_to_hbm [thread:$0]  (%p5874_p5), %s7150_s6, 8192, %s7148_s14, %s7156_s13, %s5819_s29, %s5819_s29, %s5820_s30  }
 0x30d PF: > { %p5713_p1 = scmp.ge.s32.totalorder %s5814_s12, 2  ;;  %s4051_s3 = sand.u32 1, %s5802_s9  }
 0x30e   : > { %s4052_s4 = scalar_lea.sflag [#allocation3], %s4051_s3 }
 0x30f   : > { %p5710_p2 = pnand %p5713_p1, %p5878_p6 }
 0x311   : > { %5797 = dma.done.wait (!%p5710_p2), %s4052_s4, 8192  }
 0x312   : > { %5799 = vsyncadd (!%p5710_p2), %s4052_s4, 4294959104  ;;  %p12_p3 = scmp.ge.s32.totalorder %s5861_s15, 4   ;;  %s7488_s9 = smov %s5806_s10 }
 0x313   : > { %s7489_s10 = smov %s5810_s11  ;;  %s7490_s11 = smov %s5872_s18 }
 0x314   : > { %s7491_s12 = smov %s5861_s15  ;;  %14 = sbr.rel (!%p12_p3) target bundleno = 3 (0x3), region = 63 }
 0x31b   :  { %4057 = vsyncpa [#allocation3], 1 }
 0x31c   :  { %4059 = vsyncpa [#allocation3 + $0x1], 1 }

</bundles_post_ra>
